<compile_context>
chip_gen: v7x
topology: tpu7x:2x2x1
jax: 0.10.0
libtpu: 0.0.40
codegen_flags: <defaults>
</compile_context>

<pallas_src>
import jax
import jax.numpy as jnp
from jax import lax
from jax.experimental import pallas as pl
from jax.experimental.pallas import tpu as pltpu


def rnn_kernel(tok_ref, table_ref, whh_ref, h0_ref, wout_ref, bout_ref,
               y_ref, hn_ref, h_all, e_buf):
    """Single-invocation fused RNN kernel.

    tok_ref  : (batch*seq,)    i32 SMEM  raw token ids, row-major over (batch, seq)
    table_ref: (vocab+1, Hp)   f32 VMEM  [W_ih^T + (b_ih+b_hh); bias-only row], lane-padded
    whh_ref  : (Hp, Hp)        f32 VMEM  W_hh^T zero-padded
    h0_ref   : (batch, Hp)     f32 VMEM  initial hidden state, lane-padded
    wout_ref : (Hp, Vp)        f32 VMEM  W_out^T zero-padded
    bout_ref : (1, Vp)         f32 VMEM  b_out zero-padded
    y_ref    : (seq*batch, Vp) f32       time-major logits (lane-dense)
    hn_ref   : (batch, Hp)     f32       final hidden state
    h_all    : (seq*batch, Hp) f32 VMEM  scratch: every step's hidden state
    e_buf    : (batch, Hp)     f32 VMEM  scratch: per-step gathered input-projection rows
    """
    batch = h0_ref.shape[0]
    seq = tok_ref.shape[0] // batch
    vocab = table_ref.shape[0] - 1        # last table row = bias-only (out-of-range tokens)

    whh = whh_ref[...]                    # resident in vregs across the whole recurrence

    def step(t, h):
        # Fused E gather: `batch` dynamic single-row slices of the resident table.
        for b in range(batch):            # static python loop; batch is small
            tok = tok_ref[b * seq + t]
            in_range = (tok >= 0) & (tok < vocab)
            tok = jnp.where(in_range, tok, vocab)           # OOR -> bias-only row (one_hot: 0)
            e_buf[pl.ds(b, 1), :] = table_ref[pl.ds(tok, 1), :]
        e_t = e_buf[...]                                    # (batch, Hp), lane-dense

        h_new = jnp.tanh(e_t + jnp.dot(h, whh, preferred_element_type=jnp.float32))
        start = pl.multiple_of(t * batch, batch)            # aligned sublane store
        h_all[pl.ds(start, batch), :] = h_new
        return h_new

    # Recurrence carried in vregs; bounded unroll keeps code size sane at larger seq.
    h_last = lax.fori_loop(0, seq, step, h0_ref[...], unroll=min(seq, 8))
    hn_ref[...] = h_last

    # Decoupled output projection: one large MXU matmul + single dense 128-lane writeback.
    y_ref[...] = (jnp.dot(h_all[...], wout_ref[...],
                          preferred_element_type=jnp.float32) + bout_ref[...])


def _pad_to(n, m):
    return ((n + m - 1) // m) * m


@jax.jit
def rnn_model_forward(tokens, state, w_ih, w_hh, b_ih, b_hh, w_out, b_out):
    """tokens: (batch, seq) int32; state: (1, batch, hidden) f32.

    Returns (output, new_state): output (seq*batch, vocab), new_state (1, batch, hidden),
    same contract as RNNModel.forward.
    """
    batch, seq = tokens.shape
    hidden, vocab = w_ih.shape
    hp = _pad_to(hidden, 128)             # lane-dense hidden
    vp = _pad_to(vocab, 128)              # lane-dense vocab

    f32 = jnp.float32
    bias = (b_ih + b_hh).astype(f32)[None, :]                              # (1, hidden)
    table = jnp.concatenate([w_ih.T.astype(f32) + bias, bias], axis=0)     # (vocab+1, hidden)
    table = jnp.pad(table, ((0, 0), (0, hp - hidden)))

    whh_t = jnp.pad(w_hh.T.astype(f32), ((0, hp - hidden), (0, hp - hidden)))
    wout_t = jnp.pad(w_out.T.astype(f32), ((0, hp - hidden), (0, vp - vocab)))
    bout = jnp.pad(b_out.astype(f32)[None, :], ((0, 0), (0, vp - vocab)))
    h0 = jnp.pad(state[0].astype(f32), ((0, 0), (0, hp - hidden)))

    tok_flat = tokens.reshape(-1).astype(jnp.int32)                        # (batch*seq,)

    y_pad, hn_pad = pl.pallas_call(
        rnn_kernel,
        out_shape=(
            jax.ShapeDtypeStruct((seq * batch, vp), f32),
            jax.ShapeDtypeStruct((batch, hp), f32),
        ),
        in_specs=[
            pl.BlockSpec(memory_space=pltpu.MemorySpace.SMEM),   # token ids
            pl.BlockSpec(memory_space=pltpu.MemorySpace.VMEM),   # gather table
            pl.BlockSpec(memory_space=pltpu.MemorySpace.VMEM),   # W_hh^T
            pl.BlockSpec(memory_space=pltpu.MemorySpace.VMEM),   # h0
            pl.BlockSpec(memory_space=pltpu.MemorySpace.VMEM),   # W_out^T
            pl.BlockSpec(memory_space=pltpu.MemorySpace.VMEM),   # b_out
        ],
        out_specs=(
            pl.BlockSpec(memory_space=pltpu.MemorySpace.VMEM),
            pl.BlockSpec(memory_space=pltpu.MemorySpace.VMEM),
        ),
        scratch_shapes=[
            pltpu.VMEM((seq * batch, hp), f32),   # h_all
            pltpu.VMEM((batch, hp), f32),         # e_buf
        ],
        compiler_params=pltpu.CompilerParams(vmem_limit_bytes=32 * 1024 * 1024),
    )(tok_flat, table, whh_t, h0, wout_t, bout)

    # Strip lane padding back to the module's contract shapes.
    return y_pad[:, :vocab], hn_pad[:, :hidden][None, :, :]


def reference_forward(tokens, state, w_ih, w_hh, b_ih, b_hh, w_out, b_out):
    """Pure-JAX reference matching PyTorch RNNModel.forward semantics."""
    vocab = w_ih.shape[1]
    x = jax.nn.one_hot(tokens.T, vocab, dtype=jnp.float32)   # (seq, batch, vocab)
    h0 = state[0]

    def step(h, x_t):
        h_new = jnp.tanh(x_t @ w_ih.T + h @ w_hh.T + b_ih + b_hh)
        return h_new, h_new

    h_n, ys = lax.scan(step, h0, x)                          # ys: (seq, batch, hidden)
    out = ys.reshape(-1, ys.shape[-1]) @ w_out.T + b_out
    return out, h_n[None, :, :]


if __name__ == "__main__":
    batch, seq = 8, 8
    vocab_size = 32
    num_hiddens = 32

    key = jax.random.PRNGKey(0)
    k_tok, k1, k2, k3, k4, k5, k6 = jax.random.split(key, 7)

    tokens = jax.random.randint(k_tok, (batch, seq), 0, vocab_size, dtype=jnp.int32)
    # Exercise the out-of-range path (reference one_hot -> zero row; kernel -> bias-only row).
    tokens = tokens.at[0, 0].set(vocab_size)
    state = jnp.zeros((1, batch, num_hiddens), dtype=jnp.float32)  # begin_state (1 layer)

    # Deterministic parameter init (PyTorch-style uniform(-1/sqrt(H), 1/sqrt(H))).
    s = 1.0 / jnp.sqrt(jnp.float32(num_hiddens))
    w_ih = jax.random.uniform(k1, (num_hiddens, vocab_size), jnp.float32, -s, s)
    w_hh = jax.random.uniform(k2, (num_hiddens, num_hiddens), jnp.float32, -s, s)
    b_ih = jax.random.uniform(k3, (num_hiddens,), jnp.float32, -s, s)
    b_hh = jax.random.uniform(k4, (num_hiddens,), jnp.float32, -s, s)
    w_out = jax.random.uniform(k5, (vocab_size, num_hiddens), jnp.float32, -s, s)
    b_out = jax.random.uniform(k6, (vocab_size,), jnp.float32, -s, s)

    out, new_state = rnn_model_forward(tokens, state, w_ih, w_hh, b_ih, b_hh,
                                       w_out, b_out)
    jax.block_until_ready((out, new_state))

    ref_out, ref_state = reference_forward(tokens, state, w_ih, w_hh, b_ih, b_hh,
                                           w_out, b_out)
    assert out.shape == (seq * batch, vocab_size)
    assert new_state.shape == (1, batch, num_hiddens)
    assert jnp.allclose(out, ref_out, atol=1e-4, rtol=1e-4)
    assert jnp.allclose(new_state, ref_state, atol=1e-4, rtol=1e-4)

    print("KERNEL_OK")
</pallas_src>

<mosaic_0001>
module attributes {stable_mosaic.version = 11 : i64} {
  func.func @rnn_kernel(%arg0: memref<64xi32, #tpu.memory_space<smem>>, %arg1: memref<33x128xf32, #tpu.memory_space<vmem>>, %arg2: memref<128x128xf32, #tpu.memory_space<vmem>>, %arg3: memref<8x128xf32, #tpu.memory_space<vmem>>, %arg4: memref<128x128xf32, #tpu.memory_space<vmem>>, %arg5: memref<1x128xf32, #tpu.memory_space<vmem>>, %arg6: memref<64x128xf32, #tpu.memory_space<vmem>>, %arg7: memref<8x128xf32, #tpu.memory_space<vmem>>, %arg8: memref<64x128xf32, #tpu.memory_space<vmem>>, %arg9: memref<8x128xf32, #tpu.memory_space<vmem>>) attributes {dimension_semantics = [], scalar_prefetch = 0 : i64, scratch_operands = 2 : i64, tpu.core_type = #tpu.core_type<tc>} {
    %c0 = arith.constant 0 : index
    %c0_0 = arith.constant 0 : index
    %0 = vector.load %arg2[%c0, %c0_0] : memref<128x128xf32, #tpu.memory_space<vmem>>, vector<128x128xf32>
    %c0_1 = arith.constant 0 : index
    %c0_2 = arith.constant 0 : index
    %1 = vector.load %arg3[%c0_1, %c0_2] : memref<8x128xf32, #tpu.memory_space<vmem>>, vector<8x128xf32>
    %c0_i32 = arith.constant 0 : i32
    %c0_i32_3 = arith.constant 0 : i32
    %2 = arith.addi %c0_i32_3, %c0_i32 : i32
    %3 = arith.index_cast %2 : i32 to index
    %4 = memref.load %arg0[%3] : memref<64xi32, #tpu.memory_space<smem>>
    %c0_i32_4 = arith.constant 0 : i32
    %5 = arith.cmpi sge, %4, %c0_i32_4 : i32
    %c32_i32 = arith.constant 32 : i32
    %6 = arith.cmpi slt, %4, %c32_i32 : i32
    %7 = arith.andi %5, %6 : i1
    %c32_i32_5 = arith.constant 32 : i32
    %8 = arith.select %7, %4, %c32_i32_5 : i32
    %9 = arith.index_cast %8 : i32 to index
    %c0_6 = arith.constant 0 : index
    %10 = vector.load %arg1[%9, %c0_6] : memref<33x128xf32, #tpu.memory_space<vmem>>, vector<1x128xf32>
    %c0_7 = arith.constant 0 : index
    %c0_8 = arith.constant 0 : index
    %11 = vector.load %arg9[%c0_7, %c0_8] : memref<8x128xf32, #tpu.memory_space<vmem>>, vector<1x128xf32>
    tpu.vector_store %arg9[%c0_7, %c0_8], %10 {strides = array<i32>} : memref<8x128xf32, #tpu.memory_space<vmem>>, vector<1x128xf32>,
    %c8_i32 = arith.constant 8 : i32
    %12 = arith.addi %c8_i32, %c0_i32 : i32
    %13 = arith.index_cast %12 : i32 to index
    %14 = memref.load %arg0[%13] : memref<64xi32, #tpu.memory_space<smem>>
    %c0_i32_9 = arith.constant 0 : i32
    %15 = arith.cmpi sge, %14, %c0_i32_9 : i32
    %c32_i32_10 = arith.constant 32 : i32
    %16 = arith.cmpi slt, %14, %c32_i32_10 : i32
    %17 = arith.andi %15, %16 : i1
    %c32_i32_11 = arith.constant 32 : i32
    %18 = arith.select %17, %14, %c32_i32_11 : i32
    %19 = arith.index_cast %18 : i32 to index
    %c0_12 = arith.constant 0 : index
    %20 = vector.load %arg1[%19, %c0_12] : memref<33x128xf32, #tpu.memory_space<vmem>>, vector<1x128xf32>
    %c1 = arith.constant 1 : index
    %c0_13 = arith.constant 0 : index
    %21 = vector.load %arg9[%c1, %c0_13] : memref<8x128xf32, #tpu.memory_space<vmem>>, vector<1x128xf32>
    tpu.vector_store %arg9[%c1, %c0_13], %20 {strides = array<i32>} : memref<8x128xf32, #tpu.memory_space<vmem>>, vector<1x128xf32>,
    %c16_i32 = arith.constant 16 : i32
    %22 = arith.addi %c16_i32, %c0_i32 : i32
    %23 = arith.index_cast %22 : i32 to index
    %24 = memref.load %arg0[%23] : memref<64xi32, #tpu.memory_space<smem>>
    %c0_i32_14 = arith.constant 0 : i32
    %25 = arith.cmpi sge, %24, %c0_i32_14 : i32
    %c32_i32_15 = arith.constant 32 : i32
    %26 = arith.cmpi slt, %24, %c32_i32_15 : i32
    %27 = arith.andi %25, %26 : i1
    %c32_i32_16 = arith.constant 32 : i32
    %28 = arith.select %27, %24, %c32_i32_16 : i32
    %29 = arith.index_cast %28 : i32 to index
    %c0_17 = arith.constant 0 : index
    %30 = vector.load %arg1[%29, %c0_17] : memref<33x128xf32, #tpu.memory_space<vmem>>, vector<1x128xf32>
    %c2 = arith.constant 2 : index
    %c0_18 = arith.constant 0 : index
    %31 = vector.load %arg9[%c2, %c0_18] : memref<8x128xf32, #tpu.memory_space<vmem>>, vector<1x128xf32>
    tpu.vector_store %arg9[%c2, %c0_18], %30 {strides = array<i32>} : memref<8x128xf32, #tpu.memory_space<vmem>>, vector<1x128xf32>,
    %c24_i32 = arith.constant 24 : i32
    %32 = arith.addi %c24_i32, %c0_i32 : i32
    %33 = arith.index_cast %32 : i32 to index
    %34 = memref.load %arg0[%33] : memref<64xi32, #tpu.memory_space<smem>>
    %c0_i32_19 = arith.constant 0 : i32
    %35 = arith.cmpi sge, %34, %c0_i32_19 : i32
    %c32_i32_20 = arith.constant 32 : i32
    %36 = arith.cmpi slt, %34, %c32_i32_20 : i32
    %37 = arith.andi %35, %36 : i1
    %c32_i32_21 = arith.constant 32 : i32
    %38 = arith.select %37, %34, %c32_i32_21 : i32
    %39 = arith.index_cast %38 : i32 to index
    %c0_22 = arith.constant 0 : index
    %40 = vector.load %arg1[%39, %c0_22] : memref<33x128xf32, #tpu.memory_space<vmem>>, vector<1x128xf32>
    %c3 = arith.constant 3 : index
    %c0_23 = arith.constant 0 : index
    %41 = vector.load %arg9[%c3, %c0_23] : memref<8x128xf32, #tpu.memory_space<vmem>>, vector<1x128xf32>
    tpu.vector_store %arg9[%c3, %c0_23], %40 {strides = array<i32>} : memref<8x128xf32, #tpu.memory_space<vmem>>, vector<1x128xf32>,
    %c32_i32_24 = arith.constant 32 : i32
    %42 = arith.addi %c32_i32_24, %c0_i32 : i32
    %43 = arith.index_cast %42 : i32 to index
    %44 = memref.load %arg0[%43] : memref<64xi32, #tpu.memory_space<smem>>
    %c0_i32_25 = arith.constant 0 : i32
    %45 = arith.cmpi sge, %44, %c0_i32_25 : i32
    %c32_i32_26 = arith.constant 32 : i32
    %46 = arith.cmpi slt, %44, %c32_i32_26 : i32
    %47 = arith.andi %45, %46 : i1
    %c32_i32_27 = arith.constant 32 : i32
    %48 = arith.select %47, %44, %c32_i32_27 : i32
    %49 = arith.index_cast %48 : i32 to index
    %c0_28 = arith.constant 0 : index
    %50 = vector.load %arg1[%49, %c0_28] : memref<33x128xf32, #tpu.memory_space<vmem>>, vector<1x128xf32>
    %c4 = arith.constant 4 : index
    %c0_29 = arith.constant 0 : index
    %51 = vector.load %arg9[%c4, %c0_29] : memref<8x128xf32, #tpu.memory_space<vmem>>, vector<1x128xf32>
    tpu.vector_store %arg9[%c4, %c0_29], %50 {strides = array<i32>} : memref<8x128xf32, #tpu.memory_space<vmem>>, vector<1x128xf32>,
    %c40_i32 = arith.constant 40 : i32
    %52 = arith.addi %c40_i32, %c0_i32 : i32
    %53 = arith.index_cast %52 : i32 to index
    %54 = memref.load %arg0[%53] : memref<64xi32, #tpu.memory_space<smem>>
    %c0_i32_30 = arith.constant 0 : i32
    %55 = arith.cmpi sge, %54, %c0_i32_30 : i32
    %c32_i32_31 = arith.constant 32 : i32
    %56 = arith.cmpi slt, %54, %c32_i32_31 : i32
    %57 = arith.andi %55, %56 : i1
    %c32_i32_32 = arith.constant 32 : i32
    %58 = arith.select %57, %54, %c32_i32_32 : i32
    %59 = arith.index_cast %58 : i32 to index
    %c0_33 = arith.constant 0 : index
    %60 = vector.load %arg1[%59, %c0_33] : memref<33x128xf32, #tpu.memory_space<vmem>>, vector<1x128xf32>
    %c5 = arith.constant 5 : index
    %c0_34 = arith.constant 0 : index
    %61 = vector.load %arg9[%c5, %c0_34] : memref<8x128xf32, #tpu.memory_space<vmem>>, vector<1x128xf32>
    tpu.vector_store %arg9[%c5, %c0_34], %60 {strides = array<i32>} : memref<8x128xf32, #tpu.memory_space<vmem>>, vector<1x128xf32>,
    %c48_i32 = arith.constant 48 : i32
    %62 = arith.addi %c48_i32, %c0_i32 : i32
    %63 = arith.index_cast %62 : i32 to index
    %64 = memref.load %arg0[%63] : memref<64xi32, #tpu.memory_space<smem>>
    %c0_i32_35 = arith.constant 0 : i32
    %65 = arith.cmpi sge, %64, %c0_i32_35 : i32
    %c32_i32_36 = arith.constant 32 : i32
    %66 = arith.cmpi slt, %64, %c32_i32_36 : i32
    %67 = arith.andi %65, %66 : i1
    %c32_i32_37 = arith.constant 32 : i32
    %68 = arith.select %67, %64, %c32_i32_37 : i32
    %69 = arith.index_cast %68 : i32 to index
    %c0_38 = arith.constant 0 : index
    %70 = vector.load %arg1[%69, %c0_38] : memref<33x128xf32, #tpu.memory_space<vmem>>, vector<1x128xf32>
    %c6 = arith.constant 6 : index
    %c0_39 = arith.constant 0 : index
    %71 = vector.load %arg9[%c6, %c0_39] : memref<8x128xf32, #tpu.memory_space<vmem>>, vector<1x128xf32>
    tpu.vector_store %arg9[%c6, %c0_39], %70 {strides = array<i32>} : memref<8x128xf32, #tpu.memory_space<vmem>>, vector<1x128xf32>,
    %c56_i32 = arith.constant 56 : i32
    %72 = arith.addi %c56_i32, %c0_i32 : i32
    %73 = arith.index_cast %72 : i32 to index
    %74 = memref.load %arg0[%73] : memref<64xi32, #tpu.memory_space<smem>>
    %c0_i32_40 = arith.constant 0 : i32
    %75 = arith.cmpi sge, %74, %c0_i32_40 : i32
    %c32_i32_41 = arith.constant 32 : i32
    %76 = arith.cmpi slt, %74, %c32_i32_41 : i32
    %77 = arith.andi %75, %76 : i1
    %c32_i32_42 = arith.constant 32 : i32
    %78 = arith.select %77, %74, %c32_i32_42 : i32
    %79 = arith.index_cast %78 : i32 to index
    %c0_43 = arith.constant 0 : index
    %80 = vector.load %arg1[%79, %c0_43] : memref<33x128xf32, #tpu.memory_space<vmem>>, vector<1x128xf32>
    %c7 = arith.constant 7 : index
    %c0_44 = arith.constant 0 : index
    %81 = vector.load %arg9[%c7, %c0_44] : memref<8x128xf32, #tpu.memory_space<vmem>>, vector<1x128xf32>
    tpu.vector_store %arg9[%c7, %c0_44], %80 {strides = array<i32>} : memref<8x128xf32, #tpu.memory_space<vmem>>, vector<1x128xf32>,
    %c0_45 = arith.constant 0 : index
    %c0_46 = arith.constant 0 : index
    %82 = vector.load %arg9[%c0_45, %c0_46] : memref<8x128xf32, #tpu.memory_space<vmem>>, vector<8x128xf32>
    %cst = arith.constant dense<0.000000e+00> : vector<8x128xf32>
    %83 = tpu.matmul %1, %0, %cst {dimension_numbers = #tpu.dot_dimension_numbers<[1], [0], [0], [1], [0, 0, 1, 1], [], []>} : vector<8x128xf32>, vector<128x128xf32>, vector<8x128xf32> -> vector<8x128xf32>
    %84 = arith.addf %82, %83 : vector<8x128xf32>
    %85 = math.tanh %84 : vector<8x128xf32>
    %c8_i32_47 = arith.constant 8 : i32
    %86 = arith.muli %c0_i32, %c8_i32_47 : i32
    %87 = tpu.assume_multiple %86, 8 : i32
    %88 = arith.index_cast %87 : i32 to index
    %c0_48 = arith.constant 0 : index
    %89 = vector.load %arg8[%88, %c0_48] : memref<64x128xf32, #tpu.memory_space<vmem>>, vector<8x128xf32>
    tpu.vector_store %arg8[%88, %c0_48], %85 {strides = array<i32>} : memref<64x128xf32, #tpu.memory_space<vmem>>, vector<8x128xf32>,
    %c1_i32 = arith.constant 1 : i32
    %c0_i32_49 = arith.constant 0 : i32
    %90 = arith.addi %c0_i32_49, %c1_i32 : i32
    %91 = arith.index_cast %90 : i32 to index
    %92 = memref.load %arg0[%91] : memref<64xi32, #tpu.memory_space<smem>>
    %c0_i32_50 = arith.constant 0 : i32
    %93 = arith.cmpi sge, %92, %c0_i32_50 : i32
    %c32_i32_51 = arith.constant 32 : i32
    %94 = arith.cmpi slt, %92, %c32_i32_51 : i32
    %95 = arith.andi %93, %94 : i1
    %c32_i32_52 = arith.constant 32 : i32
    %96 = arith.select %95, %92, %c32_i32_52 : i32
    %97 = arith.index_cast %96 : i32 to index
    %c0_53 = arith.constant 0 : index
    %98 = vector.load %arg1[%97, %c0_53] : memref<33x128xf32, #tpu.memory_space<vmem>>, vector<1x128xf32>
    %c0_54 = arith.constant 0 : index
    %c0_55 = arith.constant 0 : index
    %99 = vector.load %arg9[%c0_54, %c0_55] : memref<8x128xf32, #tpu.memory_space<vmem>>, vector<1x128xf32>
    tpu.vector_store %arg9[%c0_54, %c0_55], %98 {strides = array<i32>} : memref<8x128xf32, #tpu.memory_space<vmem>>, vector<1x128xf32>,
    %c8_i32_56 = arith.constant 8 : i32
    %100 = arith.addi %c8_i32_56, %c1_i32 : i32
    %101 = arith.index_cast %100 : i32 to index
    %102 = memref.load %arg0[%101] : memref<64xi32, #tpu.memory_space<smem>>
    %c0_i32_57 = arith.constant 0 : i32
    %103 = arith.cmpi sge, %102, %c0_i32_57 : i32
    %c32_i32_58 = arith.constant 32 : i32
    %104 = arith.cmpi slt, %102, %c32_i32_58 : i32
    %105 = arith.andi %103, %104 : i1
    %c32_i32_59 = arith.constant 32 : i32
    %106 = arith.select %105, %102, %c32_i32_59 : i32
    %107 = arith.index_cast %106 : i32 to index
    %c0_60 = arith.constant 0 : index
    %108 = vector.load %arg1[%107, %c0_60] : memref<33x128xf32, #tpu.memory_space<vmem>>, vector<1x128xf32>
    %c1_61 = arith.constant 1 : index
    %c0_62 = arith.constant 0 : index
    %109 = vector.load %arg9[%c1_61, %c0_62] : memref<8x128xf32, #tpu.memory_space<vmem>>, vector<1x128xf32>
    tpu.vector_store %arg9[%c1_61, %c0_62], %108 {strides = array<i32>} : memref<8x128xf32, #tpu.memory_space<vmem>>, vector<1x128xf32>,
    %c16_i32_63 = arith.constant 16 : i32
    %110 = arith.addi %c16_i32_63, %c1_i32 : i32
    %111 = arith.index_cast %110 : i32 to index
    %112 = memref.load %arg0[%111] : memref<64xi32, #tpu.memory_space<smem>>
    %c0_i32_64 = arith.constant 0 : i32
    %113 = arith.cmpi sge, %112, %c0_i32_64 : i32
    %c32_i32_65 = arith.constant 32 : i32
    %114 = arith.cmpi slt, %112, %c32_i32_65 : i32
    %115 = arith.andi %113, %114 : i1
    %c32_i32_66 = arith.constant 32 : i32
    %116 = arith.select %115, %112, %c32_i32_66 : i32
    %117 = arith.index_cast %116 : i32 to index
    %c0_67 = arith.constant 0 : index
    %118 = vector.load %arg1[%117, %c0_67] : memref<33x128xf32, #tpu.memory_space<vmem>>, vector<1x128xf32>
    %c2_68 = arith.constant 2 : index
    %c0_69 = arith.constant 0 : index
    %119 = vector.load %arg9[%c2_68, %c0_69] : memref<8x128xf32, #tpu.memory_space<vmem>>, vector<1x128xf32>
    tpu.vector_store %arg9[%c2_68, %c0_69], %118 {strides = array<i32>} : memref<8x128xf32, #tpu.memory_space<vmem>>, vector<1x128xf32>,
    %c24_i32_70 = arith.constant 24 : i32
    %120 = arith.addi %c24_i32_70, %c1_i32 : i32
    %121 = arith.index_cast %120 : i32 to index
    %122 = memref.load %arg0[%121] : memref<64xi32, #tpu.memory_space<smem>>
    %c0_i32_71 = arith.constant 0 : i32
    %123 = arith.cmpi sge, %122, %c0_i32_71 : i32
    %c32_i32_72 = arith.constant 32 : i32
    %124 = arith.cmpi slt, %122, %c32_i32_72 : i32
    %125 = arith.andi %123, %124 : i1
    %c32_i32_73 = arith.constant 32 : i32
    %126 = arith.select %125, %122, %c32_i32_73 : i32
    %127 = arith.index_cast %126 : i32 to index
    %c0_74 = arith.constant 0 : index
    %128 = vector.load %arg1[%127, %c0_74] : memref<33x128xf32, #tpu.memory_space<vmem>>, vector<1x128xf32>
    %c3_75 = arith.constant 3 : index
    %c0_76 = arith.constant 0 : index
    %129 = vector.load %arg9[%c3_75, %c0_76] : memref<8x128xf32, #tpu.memory_space<vmem>>, vector<1x128xf32>
    tpu.vector_store %arg9[%c3_75, %c0_76], %128 {strides = array<i32>} : memref<8x128xf32, #tpu.memory_space<vmem>>, vector<1x128xf32>,
    %c32_i32_77 = arith.constant 32 : i32
    %130 = arith.addi %c32_i32_77, %c1_i32 : i32
    %131 = arith.index_cast %130 : i32 to index
    %132 = memref.load %arg0[%131] : memref<64xi32, #tpu.memory_space<smem>>
    %c0_i32_78 = arith.constant 0 : i32
    %133 = arith.cmpi sge, %132, %c0_i32_78 : i32
    %c32_i32_79 = arith.constant 32 : i32
    %134 = arith.cmpi slt, %132, %c32_i32_79 : i32
    %135 = arith.andi %133, %134 : i1
    %c32_i32_80 = arith.constant 32 : i32
    %136 = arith.select %135, %132, %c32_i32_80 : i32
    %137 = arith.index_cast %136 : i32 to index
    %c0_81 = arith.constant 0 : index
    %138 = vector.load %arg1[%137, %c0_81] : memref<33x128xf32, #tpu.memory_space<vmem>>, vector<1x128xf32>
    %c4_82 = arith.constant 4 : index
    %c0_83 = arith.constant 0 : index
    %139 = vector.load %arg9[%c4_82, %c0_83] : memref<8x128xf32, #tpu.memory_space<vmem>>, vector<1x128xf32>
    tpu.vector_store %arg9[%c4_82, %c0_83], %138 {strides = array<i32>} : memref<8x128xf32, #tpu.memory_space<vmem>>, vector<1x128xf32>,
    %c40_i32_84 = arith.constant 40 : i32
    %140 = arith.addi %c40_i32_84, %c1_i32 : i32
    %141 = arith.index_cast %140 : i32 to index
    %142 = memref.load %arg0[%141] : memref<64xi32, #tpu.memory_space<smem>>
    %c0_i32_85 = arith.constant 0 : i32
    %143 = arith.cmpi sge, %142, %c0_i32_85 : i32
    %c32_i32_86 = arith.constant 32 : i32
    %144 = arith.cmpi slt, %142, %c32_i32_86 : i32
    %145 = arith.andi %143, %144 : i1
    %c32_i32_87 = arith.constant 32 : i32
    %146 = arith.select %145, %142, %c32_i32_87 : i32
    %147 = arith.index_cast %146 : i32 to index
    %c0_88 = arith.constant 0 : index
    %148 = vector.load %arg1[%147, %c0_88] : memref<33x128xf32, #tpu.memory_space<vmem>>, vector<1x128xf32>
    %c5_89 = arith.constant 5 : index
    %c0_90 = arith.constant 0 : index
    %149 = vector.load %arg9[%c5_89, %c0_90] : memref<8x128xf32, #tpu.memory_space<vmem>>, vector<1x128xf32>
    tpu.vector_store %arg9[%c5_89, %c0_90], %148 {strides = array<i32>} : memref<8x128xf32, #tpu.memory_space<vmem>>, vector<1x128xf32>,
    %c48_i32_91 = arith.constant 48 : i32
    %150 = arith.addi %c48_i32_91, %c1_i32 : i32
    %151 = arith.index_cast %150 : i32 to index
    %152 = memref.load %arg0[%151] : memref<64xi32, #tpu.memory_space<smem>>
    %c0_i32_92 = arith.constant 0 : i32
    %153 = arith.cmpi sge, %152, %c0_i32_92 : i32
    %c32_i32_93 = arith.constant 32 : i32
    %154 = arith.cmpi slt, %152, %c32_i32_93 : i32
    %155 = arith.andi %153, %154 : i1
    %c32_i32_94 = arith.constant 32 : i32
    %156 = arith.select %155, %152, %c32_i32_94 : i32
    %157 = arith.index_cast %156 : i32 to index
    %c0_95 = arith.constant 0 : index
    %158 = vector.load %arg1[%157, %c0_95] : memref<33x128xf32, #tpu.memory_space<vmem>>, vector<1x128xf32>
    %c6_96 = arith.constant 6 : index
    %c0_97 = arith.constant 0 : index
    %159 = vector.load %arg9[%c6_96, %c0_97] : memref<8x128xf32, #tpu.memory_space<vmem>>, vector<1x128xf32>
    tpu.vector_store %arg9[%c6_96, %c0_97], %158 {strides = array<i32>} : memref<8x128xf32, #tpu.memory_space<vmem>>, vector<1x128xf32>,
    %c56_i32_98 = arith.constant 56 : i32
    %160 = arith.addi %c56_i32_98, %c1_i32 : i32
    %161 = arith.index_cast %160 : i32 to index
    %162 = memref.load %arg0[%161] : memref<64xi32, #tpu.memory_space<smem>>
    %c0_i32_99 = arith.constant 0 : i32
    %163 = arith.cmpi sge, %162, %c0_i32_99 : i32
    %c32_i32_100 = arith.constant 32 : i32
    %164 = arith.cmpi slt, %162, %c32_i32_100 : i32
    %165 = arith.andi %163, %164 : i1
    %c32_i32_101 = arith.constant 32 : i32
    %166 = arith.select %165, %162, %c32_i32_101 : i32
    %167 = arith.index_cast %166 : i32 to index
    %c0_102 = arith.constant 0 : index
    %168 = vector.load %arg1[%167, %c0_102] : memref<33x128xf32, #tpu.memory_space<vmem>>, vector<1x128xf32>
    %c7_103 = arith.constant 7 : index
    %c0_104 = arith.constant 0 : index
    %169 = vector.load %arg9[%c7_103, %c0_104] : memref<8x128xf32, #tpu.memory_space<vmem>>, vector<1x128xf32>
    tpu.vector_store %arg9[%c7_103, %c0_104], %168 {strides = array<i32>} : memref<8x128xf32, #tpu.memory_space<vmem>>, vector<1x128xf32>,
    %c0_105 = arith.constant 0 : index
    %c0_106 = arith.constant 0 : index
    %170 = vector.load %arg9[%c0_105, %c0_106] : memref<8x128xf32, #tpu.memory_space<vmem>>, vector<8x128xf32>
    %cst_107 = arith.constant dense<0.000000e+00> : vector<8x128xf32>
    %171 = tpu.matmul %85, %0, %cst_107 {dimension_numbers = #tpu.dot_dimension_numbers<[1], [0], [0], [1], [0, 0, 1, 1], [], []>} : vector<8x128xf32>, vector<128x128xf32>, vector<8x128xf32> -> vector<8x128xf32>
    %172 = arith.addf %170, %171 : vector<8x128xf32>
    %173 = math.tanh %172 : vector<8x128xf32>
    %c8_i32_108 = arith.constant 8 : i32
    %174 = arith.muli %c1_i32, %c8_i32_108 : i32
    %175 = tpu.assume_multiple %174, 8 : i32
    %176 = arith.index_cast %175 : i32 to index
    %c0_109 = arith.constant 0 : index
    %177 = vector.load %arg8[%176, %c0_109] : memref<64x128xf32, #tpu.memory_space<vmem>>, vector<8x128xf32>
    tpu.vector_store %arg8[%176, %c0_109], %173 {strides = array<i32>} : memref<64x128xf32, #tpu.memory_space<vmem>>, vector<8x128xf32>,
    %c2_i32 = arith.constant 2 : i32
    %c0_i32_110 = arith.constant 0 : i32
    %178 = arith.addi %c0_i32_110, %c2_i32 : i32
    %179 = arith.index_cast %178 : i32 to index
    %180 = memref.load %arg0[%179] : memref<64xi32, #tpu.memory_space<smem>>
    %c0_i32_111 = arith.constant 0 : i32
    %181 = arith.cmpi sge, %180, %c0_i32_111 : i32
    %c32_i32_112 = arith.constant 32 : i32
    %182 = arith.cmpi slt, %180, %c32_i32_112 : i32
    %183 = arith.andi %181, %182 : i1
    %c32_i32_113 = arith.constant 32 : i32
    %184 = arith.select %183, %180, %c32_i32_113 : i32
    %185 = arith.index_cast %184 : i32 to index
    %c0_114 = arith.constant 0 : index
    %186 = vector.load %arg1[%185, %c0_114] : memref<33x128xf32, #tpu.memory_space<vmem>>, vector<1x128xf32>
    %c0_115 = arith.constant 0 : index
    %c0_116 = arith.constant 0 : index
    %187 = vector.load %arg9[%c0_115, %c0_116] : memref<8x128xf32, #tpu.memory_space<vmem>>, vector<1x128xf32>
    tpu.vector_store %arg9[%c0_115, %c0_116], %186 {strides = array<i32>} : memref<8x128xf32, #tpu.memory_space<vmem>>, vector<1x128xf32>,
    %c8_i32_117 = arith.constant 8 : i32
    %188 = arith.addi %c8_i32_117, %c2_i32 : i32
    %189 = arith.index_cast %188 : i32 to index
    %190 = memref.load %arg0[%189] : memref<64xi32, #tpu.memory_space<smem>>
    %c0_i32_118 = arith.constant 0 : i32
    %191 = arith.cmpi sge, %190, %c0_i32_118 : i32
    %c32_i32_119 = arith.constant 32 : i32
    %192 = arith.cmpi slt, %190, %c32_i32_119 : i32
    %193 = arith.andi %191, %192 : i1
    %c32_i32_120 = arith.constant 32 : i32
    %194 = arith.select %193, %190, %c32_i32_120 : i32
    %195 = arith.index_cast %194 : i32 to index
    %c0_121 = arith.constant 0 : index
    %196 = vector.load %arg1[%195, %c0_121] : memref<33x128xf32, #tpu.memory_space<vmem>>, vector<1x128xf32>
    %c1_122 = arith.constant 1 : index
    %c0_123 = arith.constant 0 : index
    %197 = vector.load %arg9[%c1_122, %c0_123] : memref<8x128xf32, #tpu.memory_space<vmem>>, vector<1x128xf32>
    tpu.vector_store %arg9[%c1_122, %c0_123], %196 {strides = array<i32>} : memref<8x128xf32, #tpu.memory_space<vmem>>, vector<1x128xf32>,
    %c16_i32_124 = arith.constant 16 : i32
    %198 = arith.addi %c16_i32_124, %c2_i32 : i32
    %199 = arith.index_cast %198 : i32 to index
    %200 = memref.load %arg0[%199] : memref<64xi32, #tpu.memory_space<smem>>
    %c0_i32_125 = arith.constant 0 : i32
    %201 = arith.cmpi sge, %200, %c0_i32_125 : i32
    %c32_i32_126 = arith.constant 32 : i32
    %202 = arith.cmpi slt, %200, %c32_i32_126 : i32
    %203 = arith.andi %201, %202 : i1
    %c32_i32_127 = arith.constant 32 : i32
    %204 = arith.select %203, %200, %c32_i32_127 : i32
    %205 = arith.index_cast %204 : i32 to index
    %c0_128 = arith.constant 0 : index
    %206 = vector.load %arg1[%205, %c0_128] : memref<33x128xf32, #tpu.memory_space<vmem>>, vector<1x128xf32>
    %c2_129 = arith.constant 2 : index
    %c0_130 = arith.constant 0 : index
    %207 = vector.load %arg9[%c2_129, %c0_130] : memref<8x128xf32, #tpu.memory_space<vmem>>, vector<1x128xf32>
    tpu.vector_store %arg9[%c2_129, %c0_130], %206 {strides = array<i32>} : memref<8x128xf32, #tpu.memory_space<vmem>>, vector<1x128xf32>,
    %c24_i32_131 = arith.constant 24 : i32
    %208 = arith.addi %c24_i32_131, %c2_i32 : i32
    %209 = arith.index_cast %208 : i32 to index
    %210 = memref.load %arg0[%209] : memref<64xi32, #tpu.memory_space<smem>>
    %c0_i32_132 = arith.constant 0 : i32
    %211 = arith.cmpi sge, %210, %c0_i32_132 : i32
    %c32_i32_133 = arith.constant 32 : i32
    %212 = arith.cmpi slt, %210, %c32_i32_133 : i32
    %213 = arith.andi %211, %212 : i1
    %c32_i32_134 = arith.constant 32 : i32
    %214 = arith.select %213, %210, %c32_i32_134 : i32
    %215 = arith.index_cast %214 : i32 to index
    %c0_135 = arith.constant 0 : index
    %216 = vector.load %arg1[%215, %c0_135] : memref<33x128xf32, #tpu.memory_space<vmem>>, vector<1x128xf32>
    %c3_136 = arith.constant 3 : index
    %c0_137 = arith.constant 0 : index
    %217 = vector.load %arg9[%c3_136, %c0_137] : memref<8x128xf32, #tpu.memory_space<vmem>>, vector<1x128xf32>
    tpu.vector_store %arg9[%c3_136, %c0_137], %216 {strides = array<i32>} : memref<8x128xf32, #tpu.memory_space<vmem>>, vector<1x128xf32>,
    %c32_i32_138 = arith.constant 32 : i32
    %218 = arith.addi %c32_i32_138, %c2_i32 : i32
    %219 = arith.index_cast %218 : i32 to index
    %220 = memref.load %arg0[%219] : memref<64xi32, #tpu.memory_space<smem>>
    %c0_i32_139 = arith.constant 0 : i32
    %221 = arith.cmpi sge, %220, %c0_i32_139 : i32
    %c32_i32_140 = arith.constant 32 : i32
    %222 = arith.cmpi slt, %220, %c32_i32_140 : i32
    %223 = arith.andi %221, %222 : i1
    %c32_i32_141 = arith.constant 32 : i32
    %224 = arith.select %223, %220, %c32_i32_141 : i32
    %225 = arith.index_cast %224 : i32 to index
    %c0_142 = arith.constant 0 : index
    %226 = vector.load %arg1[%225, %c0_142] : memref<33x128xf32, #tpu.memory_space<vmem>>, vector<1x128xf32>
    %c4_143 = arith.constant 4 : index
    %c0_144 = arith.constant 0 : index
    %227 = vector.load %arg9[%c4_143, %c0_144] : memref<8x128xf32, #tpu.memory_space<vmem>>, vector<1x128xf32>
    tpu.vector_store %arg9[%c4_143, %c0_144], %226 {strides = array<i32>} : memref<8x128xf32, #tpu.memory_space<vmem>>, vector<1x128xf32>,
    %c40_i32_145 = arith.constant 40 : i32
    %228 = arith.addi %c40_i32_145, %c2_i32 : i32
    %229 = arith.index_cast %228 : i32 to index
    %230 = memref.load %arg0[%229] : memref<64xi32, #tpu.memory_space<smem>>
    %c0_i32_146 = arith.constant 0 : i32
    %231 = arith.cmpi sge, %230, %c0_i32_146 : i32
    %c32_i32_147 = arith.constant 32 : i32
    %232 = arith.cmpi slt, %230, %c32_i32_147 : i32
    %233 = arith.andi %231, %232 : i1
    %c32_i32_148 = arith.constant 32 : i32
    %234 = arith.select %233, %230, %c32_i32_148 : i32
    %235 = arith.index_cast %234 : i32 to index
    %c0_149 = arith.constant 0 : index
    %236 = vector.load %arg1[%235, %c0_149] : memref<33x128xf32, #tpu.memory_space<vmem>>, vector<1x128xf32>
    %c5_150 = arith.constant 5 : index
    %c0_151 = arith.constant 0 : index
    %237 = vector.load %arg9[%c5_150, %c0_151] : memref<8x128xf32, #tpu.memory_space<vmem>>, vector<1x128xf32>
    tpu.vector_store %arg9[%c5_150, %c0_151], %236 {strides = array<i32>} : memref<8x128xf32, #tpu.memory_space<vmem>>, vector<1x128xf32>,
    %c48_i32_152 = arith.constant 48 : i32
    %238 = arith.addi %c48_i32_152, %c2_i32 : i32
    %239 = arith.index_cast %238 : i32 to index
    %240 = memref.load %arg0[%239] : memref<64xi32, #tpu.memory_space<smem>>
    %c0_i32_153 = arith.constant 0 : i32
    %241 = arith.cmpi sge, %240, %c0_i32_153 : i32
    %c32_i32_154 = arith.constant 32 : i32
    %242 = arith.cmpi slt, %240, %c32_i32_154 : i32
    %243 = arith.andi %241, %242 : i1
    %c32_i32_155 = arith.constant 32 : i32
    %244 = arith.select %243, %240, %c32_i32_155 : i32
    %245 = arith.index_cast %244 : i32 to index
    %c0_156 = arith.constant 0 : index
    %246 = vector.load %arg1[%245, %c0_156] : memref<33x128xf32, #tpu.memory_space<vmem>>, vector<1x128xf32>
    %c6_157 = arith.constant 6 : index
    %c0_158 = arith.constant 0 : index
    %247 = vector.load %arg9[%c6_157, %c0_158] : memref<8x128xf32, #tpu.memory_space<vmem>>, vector<1x128xf32>
    tpu.vector_store %arg9[%c6_157, %c0_158], %246 {strides = array<i32>} : memref<8x128xf32, #tpu.memory_space<vmem>>, vector<1x128xf32>,
    %c56_i32_159 = arith.constant 56 : i32
    %248 = arith.addi %c56_i32_159, %c2_i32 : i32
    %249 = arith.index_cast %248 : i32 to index
    %250 = memref.load %arg0[%249] : memref<64xi32, #tpu.memory_space<smem>>
    %c0_i32_160 = arith.constant 0 : i32
    %251 = arith.cmpi sge, %250, %c0_i32_160 : i32
    %c32_i32_161 = arith.constant 32 : i32
    %252 = arith.cmpi slt, %250, %c32_i32_161 : i32
    %253 = arith.andi %251, %252 : i1
    %c32_i32_162 = arith.constant 32 : i32
    %254 = arith.select %253, %250, %c32_i32_162 : i32
    %255 = arith.index_cast %254 : i32 to index
    %c0_163 = arith.constant 0 : index
    %256 = vector.load %arg1[%255, %c0_163] : memref<33x128xf32, #tpu.memory_space<vmem>>, vector<1x128xf32>
    %c7_164 = arith.constant 7 : index
    %c0_165 = arith.constant 0 : index
    %257 = vector.load %arg9[%c7_164, %c0_165] : memref<8x128xf32, #tpu.memory_space<vmem>>, vector<1x128xf32>
    tpu.vector_store %arg9[%c7_164, %c0_165], %256 {strides = array<i32>} : memref<8x128xf32, #tpu.memory_space<vmem>>, vector<1x128xf32>,
    %c0_166 = arith.constant 0 : index
    %c0_167 = arith.constant 0 : index
    %258 = vector.load %arg9[%c0_166, %c0_167] : memref<8x128xf32, #tpu.memory_space<vmem>>, vector<8x128xf32>
    %cst_168 = arith.constant dense<0.000000e+00> : vector<8x128xf32>
    %259 = tpu.matmul %173, %0, %cst_168 {dimension_numbers = #tpu.dot_dimension_numbers<[1], [0], [0], [1], [0, 0, 1, 1], [], []>} : vector<8x128xf32>, vector<128x128xf32>, vector<8x128xf32> -> vector<8x128xf32>
    %260 = arith.addf %258, %259 : vector<8x128xf32>
    %261 = math.tanh %260 : vector<8x128xf32>
    %c8_i32_169 = arith.constant 8 : i32
    %262 = arith.muli %c2_i32, %c8_i32_169 : i32
    %263 = tpu.assume_multiple %262, 8 : i32
    %264 = arith.index_cast %263 : i32 to index
    %c0_170 = arith.constant 0 : index
    %265 = vector.load %arg8[%264, %c0_170] : memref<64x128xf32, #tpu.memory_space<vmem>>, vector<8x128xf32>
    tpu.vector_store %arg8[%264, %c0_170], %261 {strides = array<i32>} : memref<64x128xf32, #tpu.memory_space<vmem>>, vector<8x128xf32>,
    %c3_i32 = arith.constant 3 : i32
    %c0_i32_171 = arith.constant 0 : i32
    %266 = arith.addi %c0_i32_171, %c3_i32 : i32
    %267 = arith.index_cast %266 : i32 to index
    %268 = memref.load %arg0[%267] : memref<64xi32, #tpu.memory_space<smem>>
    %c0_i32_172 = arith.constant 0 : i32
    %269 = arith.cmpi sge, %268, %c0_i32_172 : i32
    %c32_i32_173 = arith.constant 32 : i32
    %270 = arith.cmpi slt, %268, %c32_i32_173 : i32
    %271 = arith.andi %269, %270 : i1
    %c32_i32_174 = arith.constant 32 : i32
    %272 = arith.select %271, %268, %c32_i32_174 : i32
    %273 = arith.index_cast %272 : i32 to index
    %c0_175 = arith.constant 0 : index
    %274 = vector.load %arg1[%273, %c0_175] : memref<33x128xf32, #tpu.memory_space<vmem>>, vector<1x128xf32>
    %c0_176 = arith.constant 0 : index
    %c0_177 = arith.constant 0 : index
    %275 = vector.load %arg9[%c0_176, %c0_177] : memref<8x128xf32, #tpu.memory_space<vmem>>, vector<1x128xf32>
    tpu.vector_store %arg9[%c0_176, %c0_177], %274 {strides = array<i32>} : memref<8x128xf32, #tpu.memory_space<vmem>>, vector<1x128xf32>,
    %c8_i32_178 = arith.constant 8 : i32
    %276 = arith.addi %c8_i32_178, %c3_i32 : i32
    %277 = arith.index_cast %276 : i32 to index
    %278 = memref.load %arg0[%277] : memref<64xi32, #tpu.memory_space<smem>>
    %c0_i32_179 = arith.constant 0 : i32
    %279 = arith.cmpi sge, %278, %c0_i32_179 : i32
    %c32_i32_180 = arith.constant 32 : i32
    %280 = arith.cmpi slt, %278, %c32_i32_180 : i32
    %281 = arith.andi %279, %280 : i1
    %c32_i32_181 = arith.constant 32 : i32
    %282 = arith.select %281, %278, %c32_i32_181 : i32
    %283 = arith.index_cast %282 : i32 to index
    %c0_182 = arith.constant 0 : index
    %284 = vector.load %arg1[%283, %c0_182] : memref<33x128xf32, #tpu.memory_space<vmem>>, vector<1x128xf32>
    %c1_183 = arith.constant 1 : index
    %c0_184 = arith.constant 0 : index
    %285 = vector.load %arg9[%c1_183, %c0_184] : memref<8x128xf32, #tpu.memory_space<vmem>>, vector<1x128xf32>
    tpu.vector_store %arg9[%c1_183, %c0_184], %284 {strides = array<i32>} : memref<8x128xf32, #tpu.memory_space<vmem>>, vector<1x128xf32>,
    %c16_i32_185 = arith.constant 16 : i32
    %286 = arith.addi %c16_i32_185, %c3_i32 : i32
    %287 = arith.index_cast %286 : i32 to index
    %288 = memref.load %arg0[%287] : memref<64xi32, #tpu.memory_space<smem>>
    %c0_i32_186 = arith.constant 0 : i32
    %289 = arith.cmpi sge, %288, %c0_i32_186 : i32
    %c32_i32_187 = arith.constant 32 : i32
    %290 = arith.cmpi slt, %288, %c32_i32_187 : i32
    %291 = arith.andi %289, %290 : i1
    %c32_i32_188 = arith.constant 32 : i32
    %292 = arith.select %291, %288, %c32_i32_188 : i32
    %293 = arith.index_cast %292 : i32 to index
    %c0_189 = arith.constant 0 : index
    %294 = vector.load %arg1[%293, %c0_189] : memref<33x128xf32, #tpu.memory_space<vmem>>, vector<1x128xf32>
    %c2_190 = arith.constant 2 : index
    %c0_191 = arith.constant 0 : index
    %295 = vector.load %arg9[%c2_190, %c0_191] : memref<8x128xf32, #tpu.memory_space<vmem>>, vector<1x128xf32>
    tpu.vector_store %arg9[%c2_190, %c0_191], %294 {strides = array<i32>} : memref<8x128xf32, #tpu.memory_space<vmem>>, vector<1x128xf32>,
    %c24_i32_192 = arith.constant 24 : i32
    %296 = arith.addi %c24_i32_192, %c3_i32 : i32
    %297 = arith.index_cast %296 : i32 to index
    %298 = memref.load %arg0[%297] : memref<64xi32, #tpu.memory_space<smem>>
    %c0_i32_193 = arith.constant 0 : i32
    %299 = arith.cmpi sge, %298, %c0_i32_193 : i32
    %c32_i32_194 = arith.constant 32 : i32
    %300 = arith.cmpi slt, %298, %c32_i32_194 : i32
    %301 = arith.andi %299, %300 : i1
    %c32_i32_195 = arith.constant 32 : i32
    %302 = arith.select %301, %298, %c32_i32_195 : i32
    %303 = arith.index_cast %302 : i32 to index
    %c0_196 = arith.constant 0 : index
    %304 = vector.load %arg1[%303, %c0_196] : memref<33x128xf32, #tpu.memory_space<vmem>>, vector<1x128xf32>
    %c3_197 = arith.constant 3 : index
    %c0_198 = arith.constant 0 : index
    %305 = vector.load %arg9[%c3_197, %c0_198] : memref<8x128xf32, #tpu.memory_space<vmem>>, vector<1x128xf32>
    tpu.vector_store %arg9[%c3_197, %c0_198], %304 {strides = array<i32>} : memref<8x128xf32, #tpu.memory_space<vmem>>, vector<1x128xf32>,
    %c32_i32_199 = arith.constant 32 : i32
    %306 = arith.addi %c32_i32_199, %c3_i32 : i32
    %307 = arith.index_cast %306 : i32 to index
    %308 = memref.load %arg0[%307] : memref<64xi32, #tpu.memory_space<smem>>
    %c0_i32_200 = arith.constant 0 : i32
    %309 = arith.cmpi sge, %308, %c0_i32_200 : i32
    %c32_i32_201 = arith.constant 32 : i32
    %310 = arith.cmpi slt, %308, %c32_i32_201 : i32
    %311 = arith.andi %309, %310 : i1
    %c32_i32_202 = arith.constant 32 : i32
    %312 = arith.select %311, %308, %c32_i32_202 : i32
    %313 = arith.index_cast %312 : i32 to index
    %c0_203 = arith.constant 0 : index
    %314 = vector.load %arg1[%313, %c0_203] : memref<33x128xf32, #tpu.memory_space<vmem>>, vector<1x128xf32>
    %c4_204 = arith.constant 4 : index
    %c0_205 = arith.constant 0 : index
    %315 = vector.load %arg9[%c4_204, %c0_205] : memref<8x128xf32, #tpu.memory_space<vmem>>, vector<1x128xf32>
    tpu.vector_store %arg9[%c4_204, %c0_205], %314 {strides = array<i32>} : memref<8x128xf32, #tpu.memory_space<vmem>>, vector<1x128xf32>,
    %c40_i32_206 = arith.constant 40 : i32
    %316 = arith.addi %c40_i32_206, %c3_i32 : i32
    %317 = arith.index_cast %316 : i32 to index
    %318 = memref.load %arg0[%317] : memref<64xi32, #tpu.memory_space<smem>>
    %c0_i32_207 = arith.constant 0 : i32
    %319 = arith.cmpi sge, %318, %c0_i32_207 : i32
    %c32_i32_208 = arith.constant 32 : i32
    %320 = arith.cmpi slt, %318, %c32_i32_208 : i32
    %321 = arith.andi %319, %320 : i1
    %c32_i32_209 = arith.constant 32 : i32
    %322 = arith.select %321, %318, %c32_i32_209 : i32
    %323 = arith.index_cast %322 : i32 to index
    %c0_210 = arith.constant 0 : index
    %324 = vector.load %arg1[%323, %c0_210] : memref<33x128xf32, #tpu.memory_space<vmem>>, vector<1x128xf32>
    %c5_211 = arith.constant 5 : index
    %c0_212 = arith.constant 0 : index
    %325 = vector.load %arg9[%c5_211, %c0_212] : memref<8x128xf32, #tpu.memory_space<vmem>>, vector<1x128xf32>
    tpu.vector_store %arg9[%c5_211, %c0_212], %324 {strides = array<i32>} : memref<8x128xf32, #tpu.memory_space<vmem>>, vector<1x128xf32>,
    %c48_i32_213 = arith.constant 48 : i32
    %326 = arith.addi %c48_i32_213, %c3_i32 : i32
    %327 = arith.index_cast %326 : i32 to index
    %328 = memref.load %arg0[%327] : memref<64xi32, #tpu.memory_space<smem>>
    %c0_i32_214 = arith.constant 0 : i32
    %329 = arith.cmpi sge, %328, %c0_i32_214 : i32
    %c32_i32_215 = arith.constant 32 : i32
    %330 = arith.cmpi slt, %328, %c32_i32_215 : i32
    %331 = arith.andi %329, %330 : i1
    %c32_i32_216 = arith.constant 32 : i32
    %332 = arith.select %331, %328, %c32_i32_216 : i32
    %333 = arith.index_cast %332 : i32 to index
    %c0_217 = arith.constant 0 : index
    %334 = vector.load %arg1[%333, %c0_217] : memref<33x128xf32, #tpu.memory_space<vmem>>, vector<1x128xf32>
    %c6_218 = arith.constant 6 : index
    %c0_219 = arith.constant 0 : index
    %335 = vector.load %arg9[%c6_218, %c0_219] : memref<8x128xf32, #tpu.memory_space<vmem>>, vector<1x128xf32>
    tpu.vector_store %arg9[%c6_218, %c0_219], %334 {strides = array<i32>} : memref<8x128xf32, #tpu.memory_space<vmem>>, vector<1x128xf32>,
    %c56_i32_220 = arith.constant 56 : i32
    %336 = arith.addi %c56_i32_220, %c3_i32 : i32
    %337 = arith.index_cast %336 : i32 to index
    %338 = memref.load %arg0[%337] : memref<64xi32, #tpu.memory_space<smem>>
    %c0_i32_221 = arith.constant 0 : i32
    %339 = arith.cmpi sge, %338, %c0_i32_221 : i32
    %c32_i32_222 = arith.constant 32 : i32
    %340 = arith.cmpi slt, %338, %c32_i32_222 : i32
    %341 = arith.andi %339, %340 : i1
    %c32_i32_223 = arith.constant 32 : i32
    %342 = arith.select %341, %338, %c32_i32_223 : i32
    %343 = arith.index_cast %342 : i32 to index
    %c0_224 = arith.constant 0 : index
    %344 = vector.load %arg1[%343, %c0_224] : memref<33x128xf32, #tpu.memory_space<vmem>>, vector<1x128xf32>
    %c7_225 = arith.constant 7 : index
    %c0_226 = arith.constant 0 : index
    %345 = vector.load %arg9[%c7_225, %c0_226] : memref<8x128xf32, #tpu.memory_space<vmem>>, vector<1x128xf32>
    tpu.vector_store %arg9[%c7_225, %c0_226], %344 {strides = array<i32>} : memref<8x128xf32, #tpu.memory_space<vmem>>, vector<1x128xf32>,
    %c0_227 = arith.constant 0 : index
    %c0_228 = arith.constant 0 : index
    %346 = vector.load %arg9[%c0_227, %c0_228] : memref<8x128xf32, #tpu.memory_space<vmem>>, vector<8x128xf32>
    %cst_229 = arith.constant dense<0.000000e+00> : vector<8x128xf32>
    %347 = tpu.matmul %261, %0, %cst_229 {dimension_numbers = #tpu.dot_dimension_numbers<[1], [0], [0], [1], [0, 0, 1, 1], [], []>} : vector<8x128xf32>, vector<128x128xf32>, vector<8x128xf32> -> vector<8x128xf32>
    %348 = arith.addf %346, %347 : vector<8x128xf32>
    %349 = math.tanh %348 : vector<8x128xf32>
    %c8_i32_230 = arith.constant 8 : i32
    %350 = arith.muli %c3_i32, %c8_i32_230 : i32
    %351 = tpu.assume_multiple %350, 8 : i32
    %352 = arith.index_cast %351 : i32 to index
    %c0_231 = arith.constant 0 : index
    %353 = vector.load %arg8[%352, %c0_231] : memref<64x128xf32, #tpu.memory_space<vmem>>, vector<8x128xf32>
    tpu.vector_store %arg8[%352, %c0_231], %349 {strides = array<i32>} : memref<64x128xf32, #tpu.memory_space<vmem>>, vector<8x128xf32>,
    %c4_i32 = arith.constant 4 : i32
    %c0_i32_232 = arith.constant 0 : i32
    %354 = arith.addi %c0_i32_232, %c4_i32 : i32
    %355 = arith.index_cast %354 : i32 to index
    %356 = memref.load %arg0[%355] : memref<64xi32, #tpu.memory_space<smem>>
    %c0_i32_233 = arith.constant 0 : i32
    %357 = arith.cmpi sge, %356, %c0_i32_233 : i32
    %c32_i32_234 = arith.constant 32 : i32
    %358 = arith.cmpi slt, %356, %c32_i32_234 : i32
    %359 = arith.andi %357, %358 : i1
    %c32_i32_235 = arith.constant 32 : i32
    %360 = arith.select %359, %356, %c32_i32_235 : i32
    %361 = arith.index_cast %360 : i32 to index
    %c0_236 = arith.constant 0 : index
    %362 = vector.load %arg1[%361, %c0_236] : memref<33x128xf32, #tpu.memory_space<vmem>>, vector<1x128xf32>
    %c0_237 = arith.constant 0 : index
    %c0_238 = arith.constant 0 : index
    %363 = vector.load %arg9[%c0_237, %c0_238] : memref<8x128xf32, #tpu.memory_space<vmem>>, vector<1x128xf32>
    tpu.vector_store %arg9[%c0_237, %c0_238], %362 {strides = array<i32>} : memref<8x128xf32, #tpu.memory_space<vmem>>, vector<1x128xf32>,
    %c8_i32_239 = arith.constant 8 : i32
    %364 = arith.addi %c8_i32_239, %c4_i32 : i32
    %365 = arith.index_cast %364 : i32 to index
    %366 = memref.load %arg0[%365] : memref<64xi32, #tpu.memory_space<smem>>
    %c0_i32_240 = arith.constant 0 : i32
    %367 = arith.cmpi sge, %366, %c0_i32_240 : i32
    %c32_i32_241 = arith.constant 32 : i32
    %368 = arith.cmpi slt, %366, %c32_i32_241 : i32
    %369 = arith.andi %367, %368 : i1
    %c32_i32_242 = arith.constant 32 : i32
    %370 = arith.select %369, %366, %c32_i32_242 : i32
    %371 = arith.index_cast %370 : i32 to index
    %c0_243 = arith.constant 0 : index
    %372 = vector.load %arg1[%371, %c0_243] : memref<33x128xf32, #tpu.memory_space<vmem>>, vector<1x128xf32>
    %c1_244 = arith.constant 1 : index
    %c0_245 = arith.constant 0 : index
    %373 = vector.load %arg9[%c1_244, %c0_245] : memref<8x128xf32, #tpu.memory_space<vmem>>, vector<1x128xf32>
    tpu.vector_store %arg9[%c1_244, %c0_245], %372 {strides = array<i32>} : memref<8x128xf32, #tpu.memory_space<vmem>>, vector<1x128xf32>,
    %c16_i32_246 = arith.constant 16 : i32
    %374 = arith.addi %c16_i32_246, %c4_i32 : i32
    %375 = arith.index_cast %374 : i32 to index
    %376 = memref.load %arg0[%375] : memref<64xi32, #tpu.memory_space<smem>>
    %c0_i32_247 = arith.constant 0 : i32
    %377 = arith.cmpi sge, %376, %c0_i32_247 : i32
    %c32_i32_248 = arith.constant 32 : i32
    %378 = arith.cmpi slt, %376, %c32_i32_248 : i32
    %379 = arith.andi %377, %378 : i1
    %c32_i32_249 = arith.constant 32 : i32
    %380 = arith.select %379, %376, %c32_i32_249 : i32
    %381 = arith.index_cast %380 : i32 to index
    %c0_250 = arith.constant 0 : index
    %382 = vector.load %arg1[%381, %c0_250] : memref<33x128xf32, #tpu.memory_space<vmem>>, vector<1x128xf32>
    %c2_251 = arith.constant 2 : index
    %c0_252 = arith.constant 0 : index
    %383 = vector.load %arg9[%c2_251, %c0_252] : memref<8x128xf32, #tpu.memory_space<vmem>>, vector<1x128xf32>
    tpu.vector_store %arg9[%c2_251, %c0_252], %382 {strides = array<i32>} : memref<8x128xf32, #tpu.memory_space<vmem>>, vector<1x128xf32>,
    %c24_i32_253 = arith.constant 24 : i32
    %384 = arith.addi %c24_i32_253, %c4_i32 : i32
    %385 = arith.index_cast %384 : i32 to index
    %386 = memref.load %arg0[%385] : memref<64xi32, #tpu.memory_space<smem>>
    %c0_i32_254 = arith.constant 0 : i32
    %387 = arith.cmpi sge, %386, %c0_i32_254 : i32
    %c32_i32_255 = arith.constant 32 : i32
    %388 = arith.cmpi slt, %386, %c32_i32_255 : i32
    %389 = arith.andi %387, %388 : i1
    %c32_i32_256 = arith.constant 32 : i32
    %390 = arith.select %389, %386, %c32_i32_256 : i32
    %391 = arith.index_cast %390 : i32 to index
    %c0_257 = arith.constant 0 : index
    %392 = vector.load %arg1[%391, %c0_257] : memref<33x128xf32, #tpu.memory_space<vmem>>, vector<1x128xf32>
    %c3_258 = arith.constant 3 : index
    %c0_259 = arith.constant 0 : index
    %393 = vector.load %arg9[%c3_258, %c0_259] : memref<8x128xf32, #tpu.memory_space<vmem>>, vector<1x128xf32>
    tpu.vector_store %arg9[%c3_258, %c0_259], %392 {strides = array<i32>} : memref<8x128xf32, #tpu.memory_space<vmem>>, vector<1x128xf32>,
    %c32_i32_260 = arith.constant 32 : i32
    %394 = arith.addi %c32_i32_260, %c4_i32 : i32
    %395 = arith.index_cast %394 : i32 to index
    %396 = memref.load %arg0[%395] : memref<64xi32, #tpu.memory_space<smem>>
    %c0_i32_261 = arith.constant 0 : i32
    %397 = arith.cmpi sge, %396, %c0_i32_261 : i32
    %c32_i32_262 = arith.constant 32 : i32
    %398 = arith.cmpi slt, %396, %c32_i32_262 : i32
    %399 = arith.andi %397, %398 : i1
    %c32_i32_263 = arith.constant 32 : i32
    %400 = arith.select %399, %396, %c32_i32_263 : i32
    %401 = arith.index_cast %400 : i32 to index
    %c0_264 = arith.constant 0 : index
    %402 = vector.load %arg1[%401, %c0_264] : memref<33x128xf32, #tpu.memory_space<vmem>>, vector<1x128xf32>
    %c4_265 = arith.constant 4 : index
    %c0_266 = arith.constant 0 : index
    %403 = vector.load %arg9[%c4_265, %c0_266] : memref<8x128xf32, #tpu.memory_space<vmem>>, vector<1x128xf32>
    tpu.vector_store %arg9[%c4_265, %c0_266], %402 {strides = array<i32>} : memref<8x128xf32, #tpu.memory_space<vmem>>, vector<1x128xf32>,
    %c40_i32_267 = arith.constant 40 : i32
    %404 = arith.addi %c40_i32_267, %c4_i32 : i32
    %405 = arith.index_cast %404 : i32 to index
    %406 = memref.load %arg0[%405] : memref<64xi32, #tpu.memory_space<smem>>
    %c0_i32_268 = arith.constant 0 : i32
    %407 = arith.cmpi sge, %406, %c0_i32_268 : i32
    %c32_i32_269 = arith.constant 32 : i32
    %408 = arith.cmpi slt, %406, %c32_i32_269 : i32
    %409 = arith.andi %407, %408 : i1
    %c32_i32_270 = arith.constant 32 : i32
    %410 = arith.select %409, %406, %c32_i32_270 : i32
    %411 = arith.index_cast %410 : i32 to index
    %c0_271 = arith.constant 0 : index
    %412 = vector.load %arg1[%411, %c0_271] : memref<33x128xf32, #tpu.memory_space<vmem>>, vector<1x128xf32>
    %c5_272 = arith.constant 5 : index
    %c0_273 = arith.constant 0 : index
    %413 = vector.load %arg9[%c5_272, %c0_273] : memref<8x128xf32, #tpu.memory_space<vmem>>, vector<1x128xf32>
    tpu.vector_store %arg9[%c5_272, %c0_273], %412 {strides = array<i32>} : memref<8x128xf32, #tpu.memory_space<vmem>>, vector<1x128xf32>,
    %c48_i32_274 = arith.constant 48 : i32
    %414 = arith.addi %c48_i32_274, %c4_i32 : i32
    %415 = arith.index_cast %414 : i32 to index
    %416 = memref.load %arg0[%415] : memref<64xi32, #tpu.memory_space<smem>>
    %c0_i32_275 = arith.constant 0 : i32
    %417 = arith.cmpi sge, %416, %c0_i32_275 : i32
    %c32_i32_276 = arith.constant 32 : i32
    %418 = arith.cmpi slt, %416, %c32_i32_276 : i32
    %419 = arith.andi %417, %418 : i1
    %c32_i32_277 = arith.constant 32 : i32
    %420 = arith.select %419, %416, %c32_i32_277 : i32
    %421 = arith.index_cast %420 : i32 to index
    %c0_278 = arith.constant 0 : index
    %422 = vector.load %arg1[%421, %c0_278] : memref<33x128xf32, #tpu.memory_space<vmem>>, vector<1x128xf32>
    %c6_279 = arith.constant 6 : index
    %c0_280 = arith.constant 0 : index
    %423 = vector.load %arg9[%c6_279, %c0_280] : memref<8x128xf32, #tpu.memory_space<vmem>>, vector<1x128xf32>
    tpu.vector_store %arg9[%c6_279, %c0_280], %422 {strides = array<i32>} : memref<8x128xf32, #tpu.memory_space<vmem>>, vector<1x128xf32>,
    %c56_i32_281 = arith.constant 56 : i32
    %424 = arith.addi %c56_i32_281, %c4_i32 : i32
    %425 = arith.index_cast %424 : i32 to index
    %426 = memref.load %arg0[%425] : memref<64xi32, #tpu.memory_space<smem>>
    %c0_i32_282 = arith.constant 0 : i32
    %427 = arith.cmpi sge, %426, %c0_i32_282 : i32
    %c32_i32_283 = arith.constant 32 : i32
    %428 = arith.cmpi slt, %426, %c32_i32_283 : i32
    %429 = arith.andi %427, %428 : i1
    %c32_i32_284 = arith.constant 32 : i32
    %430 = arith.select %429, %426, %c32_i32_284 : i32
    %431 = arith.index_cast %430 : i32 to index
    %c0_285 = arith.constant 0 : index
    %432 = vector.load %arg1[%431, %c0_285] : memref<33x128xf32, #tpu.memory_space<vmem>>, vector<1x128xf32>
    %c7_286 = arith.constant 7 : index
    %c0_287 = arith.constant 0 : index
    %433 = vector.load %arg9[%c7_286, %c0_287] : memref<8x128xf32, #tpu.memory_space<vmem>>, vector<1x128xf32>
    tpu.vector_store %arg9[%c7_286, %c0_287], %432 {strides = array<i32>} : memref<8x128xf32, #tpu.memory_space<vmem>>, vector<1x128xf32>,
    %c0_288 = arith.constant 0 : index
    %c0_289 = arith.constant 0 : index
    %434 = vector.load %arg9[%c0_288, %c0_289] : memref<8x128xf32, #tpu.memory_space<vmem>>, vector<8x128xf32>
    %cst_290 = arith.constant dense<0.000000e+00> : vector<8x128xf32>
    %435 = tpu.matmul %349, %0, %cst_290 {dimension_numbers = #tpu.dot_dimension_numbers<[1], [0], [0], [1], [0, 0, 1, 1], [], []>} : vector<8x128xf32>, vector<128x128xf32>, vector<8x128xf32> -> vector<8x128xf32>
    %436 = arith.addf %434, %435 : vector<8x128xf32>
    %437 = math.tanh %436 : vector<8x128xf32>
    %c8_i32_291 = arith.constant 8 : i32
    %438 = arith.muli %c4_i32, %c8_i32_291 : i32
    %439 = tpu.assume_multiple %438, 8 : i32
    %440 = arith.index_cast %439 : i32 to index
    %c0_292 = arith.constant 0 : index
    %441 = vector.load %arg8[%440, %c0_292] : memref<64x128xf32, #tpu.memory_space<vmem>>, vector<8x128xf32>
    tpu.vector_store %arg8[%440, %c0_292], %437 {strides = array<i32>} : memref<64x128xf32, #tpu.memory_space<vmem>>, vector<8x128xf32>,
    %c5_i32 = arith.constant 5 : i32
    %c0_i32_293 = arith.constant 0 : i32
    %442 = arith.addi %c0_i32_293, %c5_i32 : i32
    %443 = arith.index_cast %442 : i32 to index
    %444 = memref.load %arg0[%443] : memref<64xi32, #tpu.memory_space<smem>>
    %c0_i32_294 = arith.constant 0 : i32
    %445 = arith.cmpi sge, %444, %c0_i32_294 : i32
    %c32_i32_295 = arith.constant 32 : i32
    %446 = arith.cmpi slt, %444, %c32_i32_295 : i32
    %447 = arith.andi %445, %446 : i1
    %c32_i32_296 = arith.constant 32 : i32
    %448 = arith.select %447, %444, %c32_i32_296 : i32
    %449 = arith.index_cast %448 : i32 to index
    %c0_297 = arith.constant 0 : index
    %450 = vector.load %arg1[%449, %c0_297] : memref<33x128xf32, #tpu.memory_space<vmem>>, vector<1x128xf32>
    %c0_298 = arith.constant 0 : index
    %c0_299 = arith.constant 0 : index
    %451 = vector.load %arg9[%c0_298, %c0_299] : memref<8x128xf32, #tpu.memory_space<vmem>>, vector<1x128xf32>
    tpu.vector_store %arg9[%c0_298, %c0_299], %450 {strides = array<i32>} : memref<8x128xf32, #tpu.memory_space<vmem>>, vector<1x128xf32>,
    %c8_i32_300 = arith.constant 8 : i32
    %452 = arith.addi %c8_i32_300, %c5_i32 : i32
    %453 = arith.index_cast %452 : i32 to index
    %454 = memref.load %arg0[%453] : memref<64xi32, #tpu.memory_space<smem>>
    %c0_i32_301 = arith.constant 0 : i32
    %455 = arith.cmpi sge, %454, %c0_i32_301 : i32
    %c32_i32_302 = arith.constant 32 : i32
    %456 = arith.cmpi slt, %454, %c32_i32_302 : i32
    %457 = arith.andi %455, %456 : i1
    %c32_i32_303 = arith.constant 32 : i32
    %458 = arith.select %457, %454, %c32_i32_303 : i32
    %459 = arith.index_cast %458 : i32 to index
    %c0_304 = arith.constant 0 : index
    %460 = vector.load %arg1[%459, %c0_304] : memref<33x128xf32, #tpu.memory_space<vmem>>, vector<1x128xf32>
    %c1_305 = arith.constant 1 : index
    %c0_306 = arith.constant 0 : index
    %461 = vector.load %arg9[%c1_305, %c0_306] : memref<8x128xf32, #tpu.memory_space<vmem>>, vector<1x128xf32>
    tpu.vector_store %arg9[%c1_305, %c0_306], %460 {strides = array<i32>} : memref<8x128xf32, #tpu.memory_space<vmem>>, vector<1x128xf32>,
    %c16_i32_307 = arith.constant 16 : i32
    %462 = arith.addi %c16_i32_307, %c5_i32 : i32
    %463 = arith.index_cast %462 : i32 to index
    %464 = memref.load %arg0[%463] : memref<64xi32, #tpu.memory_space<smem>>
    %c0_i32_308 = arith.constant 0 : i32
    %465 = arith.cmpi sge, %464, %c0_i32_308 : i32
    %c32_i32_309 = arith.constant 32 : i32
    %466 = arith.cmpi slt, %464, %c32_i32_309 : i32
    %467 = arith.andi %465, %466 : i1
    %c32_i32_310 = arith.constant 32 : i32
    %468 = arith.select %467, %464, %c32_i32_310 : i32
    %469 = arith.index_cast %468 : i32 to index
    %c0_311 = arith.constant 0 : index
    %470 = vector.load %arg1[%469, %c0_311] : memref<33x128xf32, #tpu.memory_space<vmem>>, vector<1x128xf32>
    %c2_312 = arith.constant 2 : index
    %c0_313 = arith.constant 0 : index
    %471 = vector.load %arg9[%c2_312, %c0_313] : memref<8x128xf32, #tpu.memory_space<vmem>>, vector<1x128xf32>
    tpu.vector_store %arg9[%c2_312, %c0_313], %470 {strides = array<i32>} : memref<8x128xf32, #tpu.memory_space<vmem>>, vector<1x128xf32>,
    %c24_i32_314 = arith.constant 24 : i32
    %472 = arith.addi %c24_i32_314, %c5_i32 : i32
    %473 = arith.index_cast %472 : i32 to index
    %474 = memref.load %arg0[%473] : memref<64xi32, #tpu.memory_space<smem>>
    %c0_i32_315 = arith.constant 0 : i32
    %475 = arith.cmpi sge, %474, %c0_i32_315 : i32
    %c32_i32_316 = arith.constant 32 : i32
    %476 = arith.cmpi slt, %474, %c32_i32_316 : i32
    %477 = arith.andi %475, %476 : i1
    %c32_i32_317 = arith.constant 32 : i32
    %478 = arith.select %477, %474, %c32_i32_317 : i32
    %479 = arith.index_cast %478 : i32 to index
    %c0_318 = arith.constant 0 : index
    %480 = vector.load %arg1[%479, %c0_318] : memref<33x128xf32, #tpu.memory_space<vmem>>, vector<1x128xf32>
    %c3_319 = arith.constant 3 : index
    %c0_320 = arith.constant 0 : index
    %481 = vector.load %arg9[%c3_319, %c0_320] : memref<8x128xf32, #tpu.memory_space<vmem>>, vector<1x128xf32>
    tpu.vector_store %arg9[%c3_319, %c0_320], %480 {strides = array<i32>} : memref<8x128xf32, #tpu.memory_space<vmem>>, vector<1x128xf32>,
    %c32_i32_321 = arith.constant 32 : i32
    %482 = arith.addi %c32_i32_321, %c5_i32 : i32
    %483 = arith.index_cast %482 : i32 to index
    %484 = memref.load %arg0[%483] : memref<64xi32, #tpu.memory_space<smem>>
    %c0_i32_322 = arith.constant 0 : i32
    %485 = arith.cmpi sge, %484, %c0_i32_322 : i32
    %c32_i32_323 = arith.constant 32 : i32
    %486 = arith.cmpi slt, %484, %c32_i32_323 : i32
    %487 = arith.andi %485, %486 : i1
    %c32_i32_324 = arith.constant 32 : i32
    %488 = arith.select %487, %484, %c32_i32_324 : i32
    %489 = arith.index_cast %488 : i32 to index
    %c0_325 = arith.constant 0 : index
    %490 = vector.load %arg1[%489, %c0_325] : memref<33x128xf32, #tpu.memory_space<vmem>>, vector<1x128xf32>
    %c4_326 = arith.constant 4 : index
    %c0_327 = arith.constant 0 : index
    %491 = vector.load %arg9[%c4_326, %c0_327] : memref<8x128xf32, #tpu.memory_space<vmem>>, vector<1x128xf32>
    tpu.vector_store %arg9[%c4_326, %c0_327], %490 {strides = array<i32>} : memref<8x128xf32, #tpu.memory_space<vmem>>, vector<1x128xf32>,
    %c40_i32_328 = arith.constant 40 : i32
    %492 = arith.addi %c40_i32_328, %c5_i32 : i32
    %493 = arith.index_cast %492 : i32 to index
    %494 = memref.load %arg0[%493] : memref<64xi32, #tpu.memory_space<smem>>
    %c0_i32_329 = arith.constant 0 : i32
    %495 = arith.cmpi sge, %494, %c0_i32_329 : i32
    %c32_i32_330 = arith.constant 32 : i32
    %496 = arith.cmpi slt, %494, %c32_i32_330 : i32
    %497 = arith.andi %495, %496 : i1
    %c32_i32_331 = arith.constant 32 : i32
    %498 = arith.select %497, %494, %c32_i32_331 : i32
    %499 = arith.index_cast %498 : i32 to index
    %c0_332 = arith.constant 0 : index
    %500 = vector.load %arg1[%499, %c0_332] : memref<33x128xf32, #tpu.memory_space<vmem>>, vector<1x128xf32>
    %c5_333 = arith.constant 5 : index
    %c0_334 = arith.constant 0 : index
    %501 = vector.load %arg9[%c5_333, %c0_334] : memref<8x128xf32, #tpu.memory_space<vmem>>, vector<1x128xf32>
    tpu.vector_store %arg9[%c5_333, %c0_334], %500 {strides = array<i32>} : memref<8x128xf32, #tpu.memory_space<vmem>>, vector<1x128xf32>,
    %c48_i32_335 = arith.constant 48 : i32
    %502 = arith.addi %c48_i32_335, %c5_i32 : i32
    %503 = arith.index_cast %502 : i32 to index
    %504 = memref.load %arg0[%503] : memref<64xi32, #tpu.memory_space<smem>>
    %c0_i32_336 = arith.constant 0 : i32
    %505 = arith.cmpi sge, %504, %c0_i32_336 : i32
    %c32_i32_337 = arith.constant 32 : i32
    %506 = arith.cmpi slt, %504, %c32_i32_337 : i32
    %507 = arith.andi %505, %506 : i1
    %c32_i32_338 = arith.constant 32 : i32
    %508 = arith.select %507, %504, %c32_i32_338 : i32
    %509 = arith.index_cast %508 : i32 to index
    %c0_339 = arith.constant 0 : index
    %510 = vector.load %arg1[%509, %c0_339] : memref<33x128xf32, #tpu.memory_space<vmem>>, vector<1x128xf32>
    %c6_340 = arith.constant 6 : index
    %c0_341 = arith.constant 0 : index
    %511 = vector.load %arg9[%c6_340, %c0_341] : memref<8x128xf32, #tpu.memory_space<vmem>>, vector<1x128xf32>
    tpu.vector_store %arg9[%c6_340, %c0_341], %510 {strides = array<i32>} : memref<8x128xf32, #tpu.memory_space<vmem>>, vector<1x128xf32>,
    %c56_i32_342 = arith.constant 56 : i32
    %512 = arith.addi %c56_i32_342, %c5_i32 : i32
    %513 = arith.index_cast %512 : i32 to index
    %514 = memref.load %arg0[%513] : memref<64xi32, #tpu.memory_space<smem>>
    %c0_i32_343 = arith.constant 0 : i32
    %515 = arith.cmpi sge, %514, %c0_i32_343 : i32
    %c32_i32_344 = arith.constant 32 : i32
    %516 = arith.cmpi slt, %514, %c32_i32_344 : i32
    %517 = arith.andi %515, %516 : i1
    %c32_i32_345 = arith.constant 32 : i32
    %518 = arith.select %517, %514, %c32_i32_345 : i32
    %519 = arith.index_cast %518 : i32 to index
    %c0_346 = arith.constant 0 : index
    %520 = vector.load %arg1[%519, %c0_346] : memref<33x128xf32, #tpu.memory_space<vmem>>, vector<1x128xf32>
    %c7_347 = arith.constant 7 : index
    %c0_348 = arith.constant 0 : index
    %521 = vector.load %arg9[%c7_347, %c0_348] : memref<8x128xf32, #tpu.memory_space<vmem>>, vector<1x128xf32>
    tpu.vector_store %arg9[%c7_347, %c0_348], %520 {strides = array<i32>} : memref<8x128xf32, #tpu.memory_space<vmem>>, vector<1x128xf32>,
    %c0_349 = arith.constant 0 : index
    %c0_350 = arith.constant 0 : index
    %522 = vector.load %arg9[%c0_349, %c0_350] : memref<8x128xf32, #tpu.memory_space<vmem>>, vector<8x128xf32>
    %cst_351 = arith.constant dense<0.000000e+00> : vector<8x128xf32>
    %523 = tpu.matmul %437, %0, %cst_351 {dimension_numbers = #tpu.dot_dimension_numbers<[1], [0], [0], [1], [0, 0, 1, 1], [], []>} : vector<8x128xf32>, vector<128x128xf32>, vector<8x128xf32> -> vector<8x128xf32>
    %524 = arith.addf %522, %523 : vector<8x128xf32>
    %525 = math.tanh %524 : vector<8x128xf32>
    %c8_i32_352 = arith.constant 8 : i32
    %526 = arith.muli %c5_i32, %c8_i32_352 : i32
    %527 = tpu.assume_multiple %526, 8 : i32
    %528 = arith.index_cast %527 : i32 to index
    %c0_353 = arith.constant 0 : index
    %529 = vector.load %arg8[%528, %c0_353] : memref<64x128xf32, #tpu.memory_space<vmem>>, vector<8x128xf32>
    tpu.vector_store %arg8[%528, %c0_353], %525 {strides = array<i32>} : memref<64x128xf32, #tpu.memory_space<vmem>>, vector<8x128xf32>,
    %c6_i32 = arith.constant 6 : i32
    %c0_i32_354 = arith.constant 0 : i32
    %530 = arith.addi %c0_i32_354, %c6_i32 : i32
    %531 = arith.index_cast %530 : i32 to index
    %532 = memref.load %arg0[%531] : memref<64xi32, #tpu.memory_space<smem>>
    %c0_i32_355 = arith.constant 0 : i32
    %533 = arith.cmpi sge, %532, %c0_i32_355 : i32
    %c32_i32_356 = arith.constant 32 : i32
    %534 = arith.cmpi slt, %532, %c32_i32_356 : i32
    %535 = arith.andi %533, %534 : i1
    %c32_i32_357 = arith.constant 32 : i32
    %536 = arith.select %535, %532, %c32_i32_357 : i32
    %537 = arith.index_cast %536 : i32 to index
    %c0_358 = arith.constant 0 : index
    %538 = vector.load %arg1[%537, %c0_358] : memref<33x128xf32, #tpu.memory_space<vmem>>, vector<1x128xf32>
    %c0_359 = arith.constant 0 : index
    %c0_360 = arith.constant 0 : index
    %539 = vector.load %arg9[%c0_359, %c0_360] : memref<8x128xf32, #tpu.memory_space<vmem>>, vector<1x128xf32>
    tpu.vector_store %arg9[%c0_359, %c0_360], %538 {strides = array<i32>} : memref<8x128xf32, #tpu.memory_space<vmem>>, vector<1x128xf32>,
    %c8_i32_361 = arith.constant 8 : i32
    %540 = arith.addi %c8_i32_361, %c6_i32 : i32
    %541 = arith.index_cast %540 : i32 to index
    %542 = memref.load %arg0[%541] : memref<64xi32, #tpu.memory_space<smem>>
    %c0_i32_362 = arith.constant 0 : i32
    %543 = arith.cmpi sge, %542, %c0_i32_362 : i32
    %c32_i32_363 = arith.constant 32 : i32
    %544 = arith.cmpi slt, %542, %c32_i32_363 : i32
    %545 = arith.andi %543, %544 : i1
    %c32_i32_364 = arith.constant 32 : i32
    %546 = arith.select %545, %542, %c32_i32_364 : i32
    %547 = arith.index_cast %546 : i32 to index
    %c0_365 = arith.constant 0 : index
    %548 = vector.load %arg1[%547, %c0_365] : memref<33x128xf32, #tpu.memory_space<vmem>>, vector<1x128xf32>
    %c1_366 = arith.constant 1 : index
    %c0_367 = arith.constant 0 : index
    %549 = vector.load %arg9[%c1_366, %c0_367] : memref<8x128xf32, #tpu.memory_space<vmem>>, vector<1x128xf32>
    tpu.vector_store %arg9[%c1_366, %c0_367], %548 {strides = array<i32>} : memref<8x128xf32, #tpu.memory_space<vmem>>, vector<1x128xf32>,
    %c16_i32_368 = arith.constant 16 : i32
    %550 = arith.addi %c16_i32_368, %c6_i32 : i32
    %551 = arith.index_cast %550 : i32 to index
    %552 = memref.load %arg0[%551] : memref<64xi32, #tpu.memory_space<smem>>
    %c0_i32_369 = arith.constant 0 : i32
    %553 = arith.cmpi sge, %552, %c0_i32_369 : i32
    %c32_i32_370 = arith.constant 32 : i32
    %554 = arith.cmpi slt, %552, %c32_i32_370 : i32
    %555 = arith.andi %553, %554 : i1
    %c32_i32_371 = arith.constant 32 : i32
    %556 = arith.select %555, %552, %c32_i32_371 : i32
    %557 = arith.index_cast %556 : i32 to index
    %c0_372 = arith.constant 0 : index
    %558 = vector.load %arg1[%557, %c0_372] : memref<33x128xf32, #tpu.memory_space<vmem>>, vector<1x128xf32>
    %c2_373 = arith.constant 2 : index
    %c0_374 = arith.constant 0 : index
    %559 = vector.load %arg9[%c2_373, %c0_374] : memref<8x128xf32, #tpu.memory_space<vmem>>, vector<1x128xf32>
    tpu.vector_store %arg9[%c2_373, %c0_374], %558 {strides = array<i32>} : memref<8x128xf32, #tpu.memory_space<vmem>>, vector<1x128xf32>,
    %c24_i32_375 = arith.constant 24 : i32
    %560 = arith.addi %c24_i32_375, %c6_i32 : i32
    %561 = arith.index_cast %560 : i32 to index
    %562 = memref.load %arg0[%561] : memref<64xi32, #tpu.memory_space<smem>>
    %c0_i32_376 = arith.constant 0 : i32
    %563 = arith.cmpi sge, %562, %c0_i32_376 : i32
    %c32_i32_377 = arith.constant 32 : i32
    %564 = arith.cmpi slt, %562, %c32_i32_377 : i32
    %565 = arith.andi %563, %564 : i1
    %c32_i32_378 = arith.constant 32 : i32
    %566 = arith.select %565, %562, %c32_i32_378 : i32
    %567 = arith.index_cast %566 : i32 to index
    %c0_379 = arith.constant 0 : index
    %568 = vector.load %arg1[%567, %c0_379] : memref<33x128xf32, #tpu.memory_space<vmem>>, vector<1x128xf32>
    %c3_380 = arith.constant 3 : index
    %c0_381 = arith.constant 0 : index
    %569 = vector.load %arg9[%c3_380, %c0_381] : memref<8x128xf32, #tpu.memory_space<vmem>>, vector<1x128xf32>
    tpu.vector_store %arg9[%c3_380, %c0_381], %568 {strides = array<i32>} : memref<8x128xf32, #tpu.memory_space<vmem>>, vector<1x128xf32>,
    %c32_i32_382 = arith.constant 32 : i32
    %570 = arith.addi %c32_i32_382, %c6_i32 : i32
    %571 = arith.index_cast %570 : i32 to index
    %572 = memref.load %arg0[%571] : memref<64xi32, #tpu.memory_space<smem>>
    %c0_i32_383 = arith.constant 0 : i32
    %573 = arith.cmpi sge, %572, %c0_i32_383 : i32
    %c32_i32_384 = arith.constant 32 : i32
    %574 = arith.cmpi slt, %572, %c32_i32_384 : i32
    %575 = arith.andi %573, %574 : i1
    %c32_i32_385 = arith.constant 32 : i32
    %576 = arith.select %575, %572, %c32_i32_385 : i32
    %577 = arith.index_cast %576 : i32 to index
    %c0_386 = arith.constant 0 : index
    %578 = vector.load %arg1[%577, %c0_386] : memref<33x128xf32, #tpu.memory_space<vmem>>, vector<1x128xf32>
    %c4_387 = arith.constant 4 : index
    %c0_388 = arith.constant 0 : index
    %579 = vector.load %arg9[%c4_387, %c0_388] : memref<8x128xf32, #tpu.memory_space<vmem>>, vector<1x128xf32>
    tpu.vector_store %arg9[%c4_387, %c0_388], %578 {strides = array<i32>} : memref<8x128xf32, #tpu.memory_space<vmem>>, vector<1x128xf32>,
    %c40_i32_389 = arith.constant 40 : i32
    %580 = arith.addi %c40_i32_389, %c6_i32 : i32
    %581 = arith.index_cast %580 : i32 to index
    %582 = memref.load %arg0[%581] : memref<64xi32, #tpu.memory_space<smem>>
    %c0_i32_390 = arith.constant 0 : i32
    %583 = arith.cmpi sge, %582, %c0_i32_390 : i32
    %c32_i32_391 = arith.constant 32 : i32
    %584 = arith.cmpi slt, %582, %c32_i32_391 : i32
    %585 = arith.andi %583, %584 : i1
    %c32_i32_392 = arith.constant 32 : i32
    %586 = arith.select %585, %582, %c32_i32_392 : i32
    %587 = arith.index_cast %586 : i32 to index
    %c0_393 = arith.constant 0 : index
    %588 = vector.load %arg1[%587, %c0_393] : memref<33x128xf32, #tpu.memory_space<vmem>>, vector<1x128xf32>
    %c5_394 = arith.constant 5 : index
    %c0_395 = arith.constant 0 : index
    %589 = vector.load %arg9[%c5_394, %c0_395] : memref<8x128xf32, #tpu.memory_space<vmem>>, vector<1x128xf32>
    tpu.vector_store %arg9[%c5_394, %c0_395], %588 {strides = array<i32>} : memref<8x128xf32, #tpu.memory_space<vmem>>, vector<1x128xf32>,
    %c48_i32_396 = arith.constant 48 : i32
    %590 = arith.addi %c48_i32_396, %c6_i32 : i32
    %591 = arith.index_cast %590 : i32 to index
    %592 = memref.load %arg0[%591] : memref<64xi32, #tpu.memory_space<smem>>
    %c0_i32_397 = arith.constant 0 : i32
    %593 = arith.cmpi sge, %592, %c0_i32_397 : i32
    %c32_i32_398 = arith.constant 32 : i32
    %594 = arith.cmpi slt, %592, %c32_i32_398 : i32
    %595 = arith.andi %593, %594 : i1
    %c32_i32_399 = arith.constant 32 : i32
    %596 = arith.select %595, %592, %c32_i32_399 : i32
    %597 = arith.index_cast %596 : i32 to index
    %c0_400 = arith.constant 0 : index
    %598 = vector.load %arg1[%597, %c0_400] : memref<33x128xf32, #tpu.memory_space<vmem>>, vector<1x128xf32>
    %c6_401 = arith.constant 6 : index
    %c0_402 = arith.constant 0 : index
    %599 = vector.load %arg9[%c6_401, %c0_402] : memref<8x128xf32, #tpu.memory_space<vmem>>, vector<1x128xf32>
    tpu.vector_store %arg9[%c6_401, %c0_402], %598 {strides = array<i32>} : memref<8x128xf32, #tpu.memory_space<vmem>>, vector<1x128xf32>,
    %c56_i32_403 = arith.constant 56 : i32
    %600 = arith.addi %c56_i32_403, %c6_i32 : i32
    %601 = arith.index_cast %600 : i32 to index
    %602 = memref.load %arg0[%601] : memref<64xi32, #tpu.memory_space<smem>>
    %c0_i32_404 = arith.constant 0 : i32
    %603 = arith.cmpi sge, %602, %c0_i32_404 : i32
    %c32_i32_405 = arith.constant 32 : i32
    %604 = arith.cmpi slt, %602, %c32_i32_405 : i32
    %605 = arith.andi %603, %604 : i1
    %c32_i32_406 = arith.constant 32 : i32
    %606 = arith.select %605, %602, %c32_i32_406 : i32
    %607 = arith.index_cast %606 : i32 to index
    %c0_407 = arith.constant 0 : index
    %608 = vector.load %arg1[%607, %c0_407] : memref<33x128xf32, #tpu.memory_space<vmem>>, vector<1x128xf32>
    %c7_408 = arith.constant 7 : index
    %c0_409 = arith.constant 0 : index
    %609 = vector.load %arg9[%c7_408, %c0_409] : memref<8x128xf32, #tpu.memory_space<vmem>>, vector<1x128xf32>
    tpu.vector_store %arg9[%c7_408, %c0_409], %608 {strides = array<i32>} : memref<8x128xf32, #tpu.memory_space<vmem>>, vector<1x128xf32>,
    %c0_410 = arith.constant 0 : index
    %c0_411 = arith.constant 0 : index
    %610 = vector.load %arg9[%c0_410, %c0_411] : memref<8x128xf32, #tpu.memory_space<vmem>>, vector<8x128xf32>
    %cst_412 = arith.constant dense<0.000000e+00> : vector<8x128xf32>
    %611 = tpu.matmul %525, %0, %cst_412 {dimension_numbers = #tpu.dot_dimension_numbers<[1], [0], [0], [1], [0, 0, 1, 1], [], []>} : vector<8x128xf32>, vector<128x128xf32>, vector<8x128xf32> -> vector<8x128xf32>
    %612 = arith.addf %610, %611 : vector<8x128xf32>
    %613 = math.tanh %612 : vector<8x128xf32>
    %c8_i32_413 = arith.constant 8 : i32
    %614 = arith.muli %c6_i32, %c8_i32_413 : i32
    %615 = tpu.assume_multiple %614, 8 : i32
    %616 = arith.index_cast %615 : i32 to index
    %c0_414 = arith.constant 0 : index
    %617 = vector.load %arg8[%616, %c0_414] : memref<64x128xf32, #tpu.memory_space<vmem>>, vector<8x128xf32>
    tpu.vector_store %arg8[%616, %c0_414], %613 {strides = array<i32>} : memref<64x128xf32, #tpu.memory_space<vmem>>, vector<8x128xf32>,
    %c7_i32 = arith.constant 7 : i32
    %c0_i32_415 = arith.constant 0 : i32
    %618 = arith.addi %c0_i32_415, %c7_i32 : i32
    %619 = arith.index_cast %618 : i32 to index
    %620 = memref.load %arg0[%619] : memref<64xi32, #tpu.memory_space<smem>>
    %c0_i32_416 = arith.constant 0 : i32
    %621 = arith.cmpi sge, %620, %c0_i32_416 : i32
    %c32_i32_417 = arith.constant 32 : i32
    %622 = arith.cmpi slt, %620, %c32_i32_417 : i32
    %623 = arith.andi %621, %622 : i1
    %c32_i32_418 = arith.constant 32 : i32
    %624 = arith.select %623, %620, %c32_i32_418 : i32
    %625 = arith.index_cast %624 : i32 to index
    %c0_419 = arith.constant 0 : index
    %626 = vector.load %arg1[%625, %c0_419] : memref<33x128xf32, #tpu.memory_space<vmem>>, vector<1x128xf32>
    %c0_420 = arith.constant 0 : index
    %c0_421 = arith.constant 0 : index
    %627 = vector.load %arg9[%c0_420, %c0_421] : memref<8x128xf32, #tpu.memory_space<vmem>>, vector<1x128xf32>
    tpu.vector_store %arg9[%c0_420, %c0_421], %626 {strides = array<i32>} : memref<8x128xf32, #tpu.memory_space<vmem>>, vector<1x128xf32>,
    %c8_i32_422 = arith.constant 8 : i32
    %628 = arith.addi %c8_i32_422, %c7_i32 : i32
    %629 = arith.index_cast %628 : i32 to index
    %630 = memref.load %arg0[%629] : memref<64xi32, #tpu.memory_space<smem>>
    %c0_i32_423 = arith.constant 0 : i32
    %631 = arith.cmpi sge, %630, %c0_i32_423 : i32
    %c32_i32_424 = arith.constant 32 : i32
    %632 = arith.cmpi slt, %630, %c32_i32_424 : i32
    %633 = arith.andi %631, %632 : i1
    %c32_i32_425 = arith.constant 32 : i32
    %634 = arith.select %633, %630, %c32_i32_425 : i32
    %635 = arith.index_cast %634 : i32 to index
    %c0_426 = arith.constant 0 : index
    %636 = vector.load %arg1[%635, %c0_426] : memref<33x128xf32, #tpu.memory_space<vmem>>, vector<1x128xf32>
    %c1_427 = arith.constant 1 : index
    %c0_428 = arith.constant 0 : index
    %637 = vector.load %arg9[%c1_427, %c0_428] : memref<8x128xf32, #tpu.memory_space<vmem>>, vector<1x128xf32>
    tpu.vector_store %arg9[%c1_427, %c0_428], %636 {strides = array<i32>} : memref<8x128xf32, #tpu.memory_space<vmem>>, vector<1x128xf32>,
    %c16_i32_429 = arith.constant 16 : i32
    %638 = arith.addi %c16_i32_429, %c7_i32 : i32
    %639 = arith.index_cast %638 : i32 to index
    %640 = memref.load %arg0[%639] : memref<64xi32, #tpu.memory_space<smem>>
    %c0_i32_430 = arith.constant 0 : i32
    %641 = arith.cmpi sge, %640, %c0_i32_430 : i32
    %c32_i32_431 = arith.constant 32 : i32
    %642 = arith.cmpi slt, %640, %c32_i32_431 : i32
    %643 = arith.andi %641, %642 : i1
    %c32_i32_432 = arith.constant 32 : i32
    %644 = arith.select %643, %640, %c32_i32_432 : i32
    %645 = arith.index_cast %644 : i32 to index
    %c0_433 = arith.constant 0 : index
    %646 = vector.load %arg1[%645, %c0_433] : memref<33x128xf32, #tpu.memory_space<vmem>>, vector<1x128xf32>
    %c2_434 = arith.constant 2 : index
    %c0_435 = arith.constant 0 : index
    %647 = vector.load %arg9[%c2_434, %c0_435] : memref<8x128xf32, #tpu.memory_space<vmem>>, vector<1x128xf32>
    tpu.vector_store %arg9[%c2_434, %c0_435], %646 {strides = array<i32>} : memref<8x128xf32, #tpu.memory_space<vmem>>, vector<1x128xf32>,
    %c24_i32_436 = arith.constant 24 : i32
    %648 = arith.addi %c24_i32_436, %c7_i32 : i32
    %649 = arith.index_cast %648 : i32 to index
    %650 = memref.load %arg0[%649] : memref<64xi32, #tpu.memory_space<smem>>
    %c0_i32_437 = arith.constant 0 : i32
    %651 = arith.cmpi sge, %650, %c0_i32_437 : i32
    %c32_i32_438 = arith.constant 32 : i32
    %652 = arith.cmpi slt, %650, %c32_i32_438 : i32
    %653 = arith.andi %651, %652 : i1
    %c32_i32_439 = arith.constant 32 : i32
    %654 = arith.select %653, %650, %c32_i32_439 : i32
    %655 = arith.index_cast %654 : i32 to index
    %c0_440 = arith.constant 0 : index
    %656 = vector.load %arg1[%655, %c0_440] : memref<33x128xf32, #tpu.memory_space<vmem>>, vector<1x128xf32>
    %c3_441 = arith.constant 3 : index
    %c0_442 = arith.constant 0 : index
    %657 = vector.load %arg9[%c3_441, %c0_442] : memref<8x128xf32, #tpu.memory_space<vmem>>, vector<1x128xf32>
    tpu.vector_store %arg9[%c3_441, %c0_442], %656 {strides = array<i32>} : memref<8x128xf32, #tpu.memory_space<vmem>>, vector<1x128xf32>,
    %c32_i32_443 = arith.constant 32 : i32
    %658 = arith.addi %c32_i32_443, %c7_i32 : i32
    %659 = arith.index_cast %658 : i32 to index
    %660 = memref.load %arg0[%659] : memref<64xi32, #tpu.memory_space<smem>>
    %c0_i32_444 = arith.constant 0 : i32
    %661 = arith.cmpi sge, %660, %c0_i32_444 : i32
    %c32_i32_445 = arith.constant 32 : i32
    %662 = arith.cmpi slt, %660, %c32_i32_445 : i32
    %663 = arith.andi %661, %662 : i1
    %c32_i32_446 = arith.constant 32 : i32
    %664 = arith.select %663, %660, %c32_i32_446 : i32
    %665 = arith.index_cast %664 : i32 to index
    %c0_447 = arith.constant 0 : index
    %666 = vector.load %arg1[%665, %c0_447] : memref<33x128xf32, #tpu.memory_space<vmem>>, vector<1x128xf32>
    %c4_448 = arith.constant 4 : index
    %c0_449 = arith.constant 0 : index
    %667 = vector.load %arg9[%c4_448, %c0_449] : memref<8x128xf32, #tpu.memory_space<vmem>>, vector<1x128xf32>
    tpu.vector_store %arg9[%c4_448, %c0_449], %666 {strides = array<i32>} : memref<8x128xf32, #tpu.memory_space<vmem>>, vector<1x128xf32>,
    %c40_i32_450 = arith.constant 40 : i32
    %668 = arith.addi %c40_i32_450, %c7_i32 : i32
    %669 = arith.index_cast %668 : i32 to index
    %670 = memref.load %arg0[%669] : memref<64xi32, #tpu.memory_space<smem>>
    %c0_i32_451 = arith.constant 0 : i32
    %671 = arith.cmpi sge, %670, %c0_i32_451 : i32
    %c32_i32_452 = arith.constant 32 : i32
    %672 = arith.cmpi slt, %670, %c32_i32_452 : i32
    %673 = arith.andi %671, %672 : i1
    %c32_i32_453 = arith.constant 32 : i32
    %674 = arith.select %673, %670, %c32_i32_453 : i32
    %675 = arith.index_cast %674 : i32 to index
    %c0_454 = arith.constant 0 : index
    %676 = vector.load %arg1[%675, %c0_454] : memref<33x128xf32, #tpu.memory_space<vmem>>, vector<1x128xf32>
    %c5_455 = arith.constant 5 : index
    %c0_456 = arith.constant 0 : index
    %677 = vector.load %arg9[%c5_455, %c0_456] : memref<8x128xf32, #tpu.memory_space<vmem>>, vector<1x128xf32>
    tpu.vector_store %arg9[%c5_455, %c0_456], %676 {strides = array<i32>} : memref<8x128xf32, #tpu.memory_space<vmem>>, vector<1x128xf32>,
    %c48_i32_457 = arith.constant 48 : i32
    %678 = arith.addi %c48_i32_457, %c7_i32 : i32
    %679 = arith.index_cast %678 : i32 to index
    %680 = memref.load %arg0[%679] : memref<64xi32, #tpu.memory_space<smem>>
    %c0_i32_458 = arith.constant 0 : i32
    %681 = arith.cmpi sge, %680, %c0_i32_458 : i32
    %c32_i32_459 = arith.constant 32 : i32
    %682 = arith.cmpi slt, %680, %c32_i32_459 : i32
    %683 = arith.andi %681, %682 : i1
    %c32_i32_460 = arith.constant 32 : i32
    %684 = arith.select %683, %680, %c32_i32_460 : i32
    %685 = arith.index_cast %684 : i32 to index
    %c0_461 = arith.constant 0 : index
    %686 = vector.load %arg1[%685, %c0_461] : memref<33x128xf32, #tpu.memory_space<vmem>>, vector<1x128xf32>
    %c6_462 = arith.constant 6 : index
    %c0_463 = arith.constant 0 : index
    %687 = vector.load %arg9[%c6_462, %c0_463] : memref<8x128xf32, #tpu.memory_space<vmem>>, vector<1x128xf32>
    tpu.vector_store %arg9[%c6_462, %c0_463], %686 {strides = array<i32>} : memref<8x128xf32, #tpu.memory_space<vmem>>, vector<1x128xf32>,
    %c56_i32_464 = arith.constant 56 : i32
    %688 = arith.addi %c56_i32_464, %c7_i32 : i32
    %689 = arith.index_cast %688 : i32 to index
    %690 = memref.load %arg0[%689] : memref<64xi32, #tpu.memory_space<smem>>
    %c0_i32_465 = arith.constant 0 : i32
    %691 = arith.cmpi sge, %690, %c0_i32_465 : i32
    %c32_i32_466 = arith.constant 32 : i32
    %692 = arith.cmpi slt, %690, %c32_i32_466 : i32
    %693 = arith.andi %691, %692 : i1
    %c32_i32_467 = arith.constant 32 : i32
    %694 = arith.select %693, %690, %c32_i32_467 : i32
    %695 = arith.index_cast %694 : i32 to index
    %c0_468 = arith.constant 0 : index
    %696 = vector.load %arg1[%695, %c0_468] : memref<33x128xf32, #tpu.memory_space<vmem>>, vector<1x128xf32>
    %c7_469 = arith.constant 7 : index
    %c0_470 = arith.constant 0 : index
    %697 = vector.load %arg9[%c7_469, %c0_470] : memref<8x128xf32, #tpu.memory_space<vmem>>, vector<1x128xf32>
    tpu.vector_store %arg9[%c7_469, %c0_470], %696 {strides = array<i32>} : memref<8x128xf32, #tpu.memory_space<vmem>>, vector<1x128xf32>,
    %c0_471 = arith.constant 0 : index
    %c0_472 = arith.constant 0 : index
    %698 = vector.load %arg9[%c0_471, %c0_472] : memref<8x128xf32, #tpu.memory_space<vmem>>, vector<8x128xf32>
    %cst_473 = arith.constant dense<0.000000e+00> : vector<8x128xf32>
    %699 = tpu.matmul %613, %0, %cst_473 {dimension_numbers = #tpu.dot_dimension_numbers<[1], [0], [0], [1], [0, 0, 1, 1], [], []>} : vector<8x128xf32>, vector<128x128xf32>, vector<8x128xf32> -> vector<8x128xf32>
    %700 = arith.addf %698, %699 : vector<8x128xf32>
    %701 = math.tanh %700 : vector<8x128xf32>
    %c8_i32_474 = arith.constant 8 : i32
    %702 = arith.muli %c7_i32, %c8_i32_474 : i32
    %703 = tpu.assume_multiple %702, 8 : i32
    %704 = arith.index_cast %703 : i32 to index
    %c0_475 = arith.constant 0 : index
    %705 = vector.load %arg8[%704, %c0_475] : memref<64x128xf32, #tpu.memory_space<vmem>>, vector<8x128xf32>
    tpu.vector_store %arg8[%704, %c0_475], %701 {strides = array<i32>} : memref<64x128xf32, #tpu.memory_space<vmem>>, vector<8x128xf32>,
    %c8_i32_476 = arith.constant 8 : i32
    %c0_477 = arith.constant 0 : index
    %c0_478 = arith.constant 0 : index
    %706 = vector.load %arg7[%c0_477, %c0_478] : memref<8x128xf32, #tpu.memory_space<vmem>>, vector<8x128xf32>
    tpu.vector_store %arg7[%c0_477, %c0_478], %701 {strides = array<i32>} : memref<8x128xf32, #tpu.memory_space<vmem>>, vector<8x128xf32>,
    %c0_479 = arith.constant 0 : index
    %c0_480 = arith.constant 0 : index
    %707 = vector.load %arg8[%c0_479, %c0_480] : memref<64x128xf32, #tpu.memory_space<vmem>>, vector<64x128xf32>
    %c0_481 = arith.constant 0 : index
    %c0_482 = arith.constant 0 : index
    %708 = vector.load %arg4[%c0_481, %c0_482] : memref<128x128xf32, #tpu.memory_space<vmem>>, vector<128x128xf32>
    %cst_483 = arith.constant dense<0.000000e+00> : vector<64x128xf32>
    %709 = tpu.matmul %707, %708, %cst_483 {dimension_numbers = #tpu.dot_dimension_numbers<[1], [0], [0], [1], [0, 0, 1, 1], [], []>} : vector<64x128xf32>, vector<128x128xf32>, vector<64x128xf32> -> vector<64x128xf32>
    %c0_484 = arith.constant 0 : index
    %c0_485 = arith.constant 0 : index
    %710 = vector.load %arg5[%c0_484, %c0_485] : memref<1x128xf32, #tpu.memory_space<vmem>>, vector<1x128xf32>
    %711 = vector.broadcast %710 : vector<1x128xf32> to vector<64x128xf32>
    %712 = arith.addf %709, %711 : vector<64x128xf32>
    %c0_486 = arith.constant 0 : index
    %c0_487 = arith.constant 0 : index
    %713 = vector.load %arg6[%c0_486, %c0_487] : memref<64x128xf32, #tpu.memory_space<vmem>>, vector<64x128xf32>
    tpu.vector_store %arg6[%c0_486, %c0_487], %712 {strides = array<i32>} : memref<64x128xf32, #tpu.memory_space<vmem>>, vector<64x128xf32>,
    return
  }
}

</mosaic_0001>

<bundles_post_ra>
// kernel: rnn_model_forward.1
= control target key start
LH: loop header
LB: loop body
LE: loop exit
PB: predicated region body
PF: predicated region fallthrough
CT: control target
= control target key end

     0   :  { %13 = vsyncpa [#allocation5], 0  ;;  %s3158_s0 = inlined_call_operand.vmem [shape: s32[64], index: 0, kind: input, shape index: {}]   ;;  %s3159_s1 = inlined_call_operand.vmem [shape: f32[33,128], index: 1, kind: input, shape index: {}]   ;;  %s3160_s2 = inlined_call_operand.vmem [shape: f32[128,128], index: 2, kind: input, shape index: {}]   ;;  %s3161_s3 = inlined_call_operand.vmem [shape: f32[8,128], index: 3, kind: input, shape index: {}]   ;;  %s3162_s4 = inlined_call_operand.vmem [shape: f32[128,128], index: 4, kind: input, shape index: {}]   ;;  %s3163_s5 = inlined_call_operand.vmem [shape: f32[1,128], index: 5, kind: input, shape index: {}]   ;;  %s3164_s6 = inlined_call_operand.vmem [shape: f32[64,128], index: 6, kind: output, shape index: {0}]   ;;  %s3165_s7 = inlined_call_operand.vmem [shape: f32[8,128], index: 7, kind: output, shape index: {1}]  }
   0x1   :  { %s20_s26 = sshll.u32 %s3158_s0, 4  ;;  %s21_s26 = int_to_ptr.vmem [resolvable:$true] %s20_s26 }
   0x2   :  { %s2304_s27 = scalar_lea.vmem %s21_s26, 16  ;;  %p2309_p1 = scmp.lt.s32.totalorder %s21_s26, %s21_s26 }
   0x3   :  { %p2305_p0 = scmp.ne.s32.totalorder %s21_s26, %s2304_s27  ;;  %p2310_p2 = scmp.lt.s32.totalorder %s2304_s27, %s2304_s27 }
   0x5   :  { %p2311_p3 = por %p2310_p2, %p2309_p1 }
   0x7   :  { %p2312_p4 = pnand %p2311_p3, %p2305_p0 }
   0x9   :  { %2315 = shalt.err (!%p2312_p4)
}
   0xa   :  { %s2318_s28 = smov [#allocation4]  }
   0xb   :  { %23 = dma.vmem_to_smem %s21_s26, 16, %s2318_s28, [#allocation5]  }
   0xc   :  { %2316 = dma.done.wait [#allocation5], 16  }
   0xd   :  { %2317 = vsyncadd [#allocation5], 4294967280 }
   0xe   :  { %37 = sfence }
   0xf   :  { %v38_v0 = vld [vmem:[%s3160_s2] sm:$0xff]  ;;  %v39_v1 = vld [vmem:[%s3160_s2 + $0x8] sm:$0xff]  ;;  %v40_v2 = vld [vmem:[%s3160_s2 + $0x10] sm:$0xff]  ;;  %v2319_v3 = vmov 0.0|0.0   ;;  %vm2320_vm0 = vmmov 0   ;;  %v2321_v6 = vmov 0.0  }
  0x10   :  { %2060 = vmatprep.subr.bf16.mxu1 %v2319_v3  ;;  %v2375_v4 = vpack.c.bf16 %v39_v1, %v38_v0  ;;  %v41_v5 = vld [vmem:[%s3160_s2 + $0x18] sm:$0xff]  ;;  %1768 = vmatprep.mubr.msk.f32.mxu1 %vm2320_vm0, %v2321_v6  ;;  %s2382_s13 = sld [smem:[#allocation4]]  ;;  %v42_v8 = vld [vmem:[%s3160_s2 + $0x20] sm:$0xff]  ;;  %v43_v9 = vld [vmem:[%s3160_s2 + $0x28] sm:$0xff]  ;;  %s2592_s10 = sld [smem:[#allocation4 + $0x19]] }
  0x11   :  { %s2384_s14 = sld [smem:[#allocation4 + $0x8]]  ;;  %2108 = vmatprep.subr.bf16.mxu0 %v2319_v3  ;;  %1838 = vmatprep.mubr.msk.f32.mxu0 %vm2320_vm0, %v2321_v6  ;;  %v2390_v7 = vpack.c.bf16 %v41_v5, %v40_v2  ;;  %v2414_v10 = vpack.c.bf16 %v43_v9, %v42_v8  ;;  %v44_v11 = vld [vmem:[%s3160_s2 + $0x30] sm:$0xff]  ;;  %v45_v12 = vld [vmem:[%s3160_s2 + $0x38] sm:$0xff]  ;;  %v46_v14 = vld [vmem:[%s3160_s2 + $0x40] sm:$0xff]  ;;  %s2594_s11 = sld [smem:[#allocation4 + $0x21]] }
  0x12   :  { %2062 = vmatpush3.bf16.msra.mxu1 %v2375_v4  ;;  %s2392_s15 = sld [smem:[#allocation4 + $0x10]]  ;;  %2110 = vmatpush3.bf16.msra.mxu0 %v2375_v4  ;;  %v2436_v13 = vpack.c.bf16 %v45_v12, %v44_v11  ;;  %v47_v15 = vld [vmem:[%s3160_s2 + $0x48] sm:$0xff]  ;;  %v48_v19 = vld [vmem:[%s3160_s2 + $0x50] sm:$0xff]  ;;  %v49_v20 = vld [vmem:[%s3160_s2 + $0x58] sm:$0xff]  ;;  %s2600_s17 = sld [smem:[#allocation4 + $0x39]] }
  0x13   :  { %2063 = vmatprep.subr.bf16.mxu1 %v2319_v3  ;;  %s2402_s20 = sld [smem:[#allocation4 + $0x18]]  ;;  %2111 = vmatprep.subr.bf16.mxu0 %v2319_v3  ;;  %v2465_v17 = vpack.c.bf16 %v47_v15, %v46_v14  ;;  %v2493_v22 = vpack.c.bf16 %v49_v20, %v48_v19  ;;  %v50_v23 = vld [vmem:[%s3160_s2 + $0x60] sm:$0xff]  ;;  %v51_v24 = vld [vmem:[%s3160_s2 + $0x68] sm:$0xff]  ;;  %v52_v27 = vld [vmem:[%s3160_s2 + $0x70] sm:$0xff]  ;;  %s2673_s25 = sld [smem:[#allocation4 + $0x32]] }
  0x14   :  { %s2405_s21 = sld [smem:[#allocation4 + $0x20]]  ;;  %v2525_v25 = vpack.c.bf16 %v51_v24, %v50_v23  ;;  %v53_v28 = vld [vmem:[%s3160_s2 + $0x78] sm:$0xff]  ;;  %v54_v32 = vld [vmem:[%s3161_s3] sm:$0xff]  ;;  %s1463_s3 = sld [smem:[#allocation4 + $0x1]] }
  0x15   :  { %s2407_s22 = sld [smem:[#allocation4 + $0x28]]  ;;  %v2550_v30 = vpack.c.bf16 %v53_v28, %v52_v27  ;;  %s2748_s2 = sld [smem:[#allocation4 + $0x33]] }
  0x16   :  { %s2409_s23 = sld [smem:[#allocation4 + $0x30]]  ;;  %2065 = vmatpush3.bf16.msra.mxu1 %v2390_v7  ;;  %p56_p5 = scmp.ge.s32.totalorder %s2382_s13, 0  ;;  %2113 = vmatpush3.bf16.msra.mxu0 %v2390_v7 }
  0x17   :  { %s2411_s24 = sld [smem:[#allocation4 + $0x38]]  ;;  %p57_p6 = scmp.lt.s32.totalorder %s2382_s13, 32  ;;  %2066 = vmatprep.subr.bf16.mxu1 %v2319_v3  ;;  %2114 = vmatprep.subr.bf16.mxu0 %v2319_v3 }
  0x18   :  { %p65_p7 = scmp.ge.s32.totalorder %s2384_s14, 0  ;;  %p66_p8 = scmp.lt.s32.totalorder %s2384_s14, 32 }
  0x19   :  { %p58_p9 = pnand %p57_p6, %p56_p5  ;;  %p74_p10 = scmp.ge.s32.totalorder %s2392_s15, 0 }
  0x1a   :  { %p2430_p11 = pnand %p66_p8, %p65_p7  ;;  %p75_p12 = scmp.lt.s32.totalorder %s2392_s15, 32  ;;  %2068 = vmatpush3.bf16.msra.mxu1 %v2414_v10  ;;  %2116 = vmatpush3.bf16.msra.mxu0 %v2414_v10 }
  0x1b   :  { %s3172_s13 = smov (%p58_p9, %s2382_s13), 32  ;;  %2069 = vmatprep.subr.bf16.mxu1 %v2319_v3  ;;  %2117 = vmatprep.subr.bf16.mxu0 %v2319_v3  ;;  %p83_p0 = scmp.ge.s32.totalorder %s2402_s20, 0 }
  0x1c   :  { %s3174_s14 = smov (%p2430_p11, %s2384_s14), 32  ;;  %s61_s12 = scalar_lea.vmem %s3159_s1, %s3172_s13 }
  0x1d   :  { %p2456_p13 = pnand %p75_p12, %p74_p10  ;;  %v62_v16 = vld [vmem:[%s61_s12] sm:$0x1]  ;;  %s70_s19 = scalar_lea.vmem %s3159_s1, %s3174_s14 }
  0x1e   :  { %2071 = vmatpush3.bf16.msra.mxu1 %v2436_v13  ;;  %63 = vst [vmem:[#allocation3] sm:$0x1] %v62_v16  ;;  %v71_v18 = vld [vmem:[%s70_s19] sm:$0x1]  ;;  %2119 = vmatpush3.bf16.msra.mxu0 %v2436_v13  ;;  %p84_p1 = scmp.lt.s32.totalorder %s2402_s20, 32  ;;  %p92_p2 = scmp.ge.s32.totalorder %s2405_s21, 0 }
  0x1f   :  { %s3176_s15 = smov (%p2456_p13, %s2392_s15), 32  ;;  %2072 = vmatprep.subr.bf16.mxu1 %v2319_v3  ;;  %72 = vst [vmem:[#allocation3 + $0x1] sm:$0x1] %v71_v18  ;;  %2120 = vmatprep.subr.bf16.mxu0 %v2319_v3  ;;  %p93_p3 = scmp.lt.s32.totalorder %s2405_s21, 32 }
  0x20   :  { %s79_s29 = scalar_lea.vmem %s3159_s1, %s3176_s15  ;;  %p2487_p4 = pnand %p84_p1, %p83_p0 }
  0x21   :  { %v80_v21 = vld [vmem:[%s79_s29] sm:$0x1]  ;;  %p101_p5 = scmp.ge.s32.totalorder %s2407_s22, 0  ;;  %p2495_p6 = pnand %p93_p3, %p92_p2 }
  0x22   :  { %2074 = vmatpush3.bf16.msra.mxu1 %v2465_v17  ;;  %81 = vst [vmem:[#allocation3 + $0x2] sm:$0x1] %v80_v21  ;;  %p102_p7 = scmp.lt.s32.totalorder %s2407_s22, 32  ;;  %2122 = vmatpush3.bf16.msra.mxu0 %v2465_v17  ;;  %s3178_s20 = smov (%p2487_p4, %s2402_s20), 32 }
  0x23   :  { %2075 = vmatprep.subr.bf16.mxu1 %v2319_v3  ;;  %2123 = vmatprep.subr.bf16.mxu0 %v2319_v3  ;;  %s3180_s21 = smov (%p2495_p6, %s2405_s21), 32  ;;  %s88_s16 = scalar_lea.vmem %s3159_s1, %s3178_s20 }
  0x24   :  { %p2520_p8 = pnand %p102_p7, %p101_p5  ;;  %v89_v26 = vld [vmem:[%s88_s16] sm:$0x1]  ;;  %s97_s13 = scalar_lea.vmem %s3159_s1, %s3180_s21 }
  0x25   :  { %p110_p9 = scmp.ge.s32.totalorder %s2409_s23, 0  ;;  %90 = vst [vmem:[#allocation3 + $0x3] sm:$0x1] %v89_v26  ;;  %v98_v29 = vld [vmem:[%s97_s13] sm:$0x1]  ;;  %p111_p10 = scmp.lt.s32.totalorder %s2409_s23, 32 }
  0x26   :  { %2077 = vmatpush3.bf16.msra.mxu1 %v2493_v22  ;;  %2125 = vmatpush3.bf16.msra.mxu0 %v2493_v22  ;;  %s3182_s22 = smov (%p2520_p8, %s2407_s22), 32  ;;  %99 = vst [vmem:[#allocation3 + $0x4] sm:$0x1] %v98_v29  ;;  %p119_p11 = scmp.ge.s32.totalorder %s2411_s24, 0 }
  0x27   :  { %2078 = vmatprep.subr.bf16.mxu1 %v2319_v3  ;;  %2126 = vmatprep.subr.bf16.mxu0 %v2319_v3  ;;  %s106_s28 = scalar_lea.vmem %s3159_s1, %s3182_s22  ;;  %p120_p12 = scmp.lt.s32.totalorder %s2411_s24, 32 }
  0x28   :  { %v107_v31 = vld [vmem:[%s106_s28] sm:$0x1]  ;;  %p112_p13 = pnand %p111_p10, %p110_p9  ;;  %s2596_s12 = sld [smem:[#allocation4 + $0x29]] }
  0x29   :  { %108 = vst [vmem:[#allocation3 + $0x5] sm:$0x1] %v107_v31  ;;  %p121_p0 = pnand %p120_p12, %p119_p11  ;;  %s2598_s16 = sld [smem:[#allocation4 + $0x31]] }
  0x2a   :  { %2080 = vmatpush3.bf16.msra.mxu1 %v2525_v25  ;;  %2128 = vmatpush3.bf16.msra.mxu0 %v2525_v25  ;;  %s3184_s23 = smov (%p112_p13, %s2409_s23), 32  ;;  %p202_p1 = scmp.ge.s32.totalorder %s1463_s3, 0 }
  0x2b   :  { %2081 = vmatprep.subr.bf16.mxu1 %v2319_v3  ;;  %2129 = vmatprep.subr.bf16.mxu0 %v2319_v3  ;;  %s3186_s24 = smov (%p121_p0, %s2411_s24), 32  ;;  %s115_s8 = scalar_lea.vmem %s3159_s1, %s3184_s23 }
  0x2c   :  { %v116_v33 = vld [vmem:[%s115_s8] sm:$0x1]  ;;  %s124_s0 = scalar_lea.vmem %s3159_s1, %s3186_s24  ;;  %s1465_s23 = sld [smem:[#allocation4 + $0x9]] }
  0x2d   :  { %117 = vst [vmem:[#allocation3 + $0x6] sm:$0x1] %v116_v33  ;;  %v125_v34 = vld [vmem:[%s124_s0] sm:$0x1]  ;;  %s2590_s24 = sld [smem:[#allocation4 + $0x11]]  ;;  %p203_p2 = scmp.lt.s32.totalorder %s1463_s3, 32 }
  0x2e   :  { %2083 = vmatpush3.bf16.msra.mxu1 %v2550_v30  ;;  %2131 = vmatpush3.bf16.msra.mxu0 %v2550_v30  ;;  %126 = vst [vmem:[#allocation3 + $0x7] sm:$0x1] %v125_v34  ;;  %p229_p10 = scmp.ge.s32.totalorder %s2592_s10, 0  ;;  %p230_p11 = scmp.lt.s32.totalorder %s2592_s10, 32 }
  0x2f   :  { %2084 = vmatprep.subr.bf16.mxu1 %v2319_v3  ;;  %2156 = vmatprep.subr.bf16.mxu0 %v2319_v3  ;;  %p204_p5 = pnand %p203_p2, %p202_p1  ;;  %p238_p12 = scmp.ge.s32.totalorder %s2594_s11, 0 }
  0x30   :  { %p239_p13 = scmp.lt.s32.totalorder %s2594_s11, 32  ;;  %p231_p0 = pnand %p230_p11, %p229_p10 }
  0x31   :  { %1769 = vmatmul.mubr.f32.vlgmr.msra.gmra.mrb[0].mxu1 %v54_v32  ;;  %s3188_s3 = smov (%p204_p5, %s1463_s3), 32  ;;  %p247_p1 = scmp.ge.s32.totalorder %s2596_s12, 0 }
  0x32   :  { %2086 = vmatpush3.bf16.msra.mxu1 %v2375_v4  ;;  %1803 = vmatprep.mubr.msk.f32.mxu1 %vm2320_vm0, %v2321_v6  ;;  %p211_p3 = scmp.ge.s32.totalorder %s1465_s23, 0  ;;  %p212_p4 = scmp.lt.s32.totalorder %s1465_s23, 32 }
  0x33   :  { %2087 = vmatprep.subr.bf16.mxu1 %v2319_v3  ;;  %p220_p6 = scmp.ge.s32.totalorder %s2590_s24, 0  ;;  %p221_p8 = scmp.lt.s32.totalorder %s2590_s24, 32 }
  0x34   :  { %p213_p7 = pnand %p212_p4, %p211_p3  ;;  %s207_s13 = scalar_lea.vmem %s3159_s1, %s3188_s3 }
  0x35   :  { %p222_p9 = pnand %p221_p8, %p220_p6  ;;  %v127_v35 = vld [vmem:[#allocation3] sm:$0xff]  ;;  %p240_p2 = pnand %p239_p13, %p238_p12 }
  0x36   :  { %2089 = vmatpush3.bf16.msra.mxu1 %v2390_v7  ;;  %s3190_s23 = smov (%p213_p7, %s1465_s23), 32  ;;  %v208_v36 = vld [vmem:[%s207_s13] sm:$0x1]  ;;  %p248_p3 = scmp.lt.s32.totalorder %s2596_s12, 32 }
  0x37   :  { %2090 = vmatprep.subr.bf16.mxu1 %v2319_v3  ;;  %s216_s14 = scalar_lea.vmem %s3159_s1, %s3190_s23  ;;  %209 = vst [vmem:[#allocation3] sm:$0x1] %v208_v36  ;;  %s3192_s24 = smov (%p222_p9, %s2590_s24), 32 }
  0x38   :  { %v217_v37 = vld [vmem:[%s216_s14] sm:$0x1]  ;;  %s225_s27 = scalar_lea.vmem %s3159_s1, %s3192_s24  ;;  %s3194_s10 = smov (%p231_p0, %s2592_s10), 32 }
  0x39   :  { %218 = vst [vmem:[#allocation3 + $0x1] sm:$0x1] %v217_v37  ;;  %v226_v38 = vld [vmem:[%s225_s27] sm:$0x1]  ;;  %s3196_s11 = smov (%p240_p2, %s2594_s11), 32  ;;  %s234_s22 = scalar_lea.vmem %s3159_s1, %s3194_s10 }
  0x3a   :  { %2092 = vmatpush3.bf16.msra.mxu1 %v2414_v10  ;;  %227 = vst [vmem:[#allocation3 + $0x2] sm:$0x1] %v226_v38  ;;  %p249_p4 = pnand %p248_p3, %p247_p1  ;;  %v235_v39 = vld [vmem:[%s234_s22] sm:$0x1]  ;;  %s243_s8 = scalar_lea.vmem %s3159_s1, %s3196_s11 }
  0x3b   :  { %2093 = vmatprep.subr.bf16.mxu1 %v2319_v3  ;;  %p256_p5 = scmp.ge.s32.totalorder %s2598_s16, 0  ;;  %236 = vst [vmem:[#allocation3 + $0x3] sm:$0x1] %v235_v39  ;;  %v244_v40 = vld [vmem:[%s243_s8] sm:$0x1]  ;;  %p257_p6 = scmp.lt.s32.totalorder %s2598_s16, 32 }
  0x3c   :  { %s3198_s12 = smov (%p249_p4, %s2596_s12), 32  ;;  %245 = vst [vmem:[#allocation3 + $0x4] sm:$0x1] %v244_v40  ;;  %p265_p7 = scmp.ge.s32.totalorder %s2600_s17, 0 }
  0x3d   :  { %s252_s0 = scalar_lea.vmem %s3159_s1, %s3198_s12  ;;  %p266_p8 = scmp.lt.s32.totalorder %s2600_s17, 32 }
  0x3e   :  { %2095 = vmatpush3.bf16.msra.mxu1 %v2436_v13  ;;  %v253_v41 = vld [vmem:[%s252_s0] sm:$0x1]  ;;  %p258_p9 = pnand %p257_p6, %p256_p5  ;;  %s1479_s12 = sld [smem:[#allocation4 + $0x2]] }
  0x3f   :  { %2096 = vmatprep.subr.bf16.mxu1 %v2319_v3  ;;  %254 = vst [vmem:[#allocation3 + $0x5] sm:$0x1] %v253_v41  ;;  %p267_p10 = pnand %p266_p8, %p265_p7  ;;  %s2667_s19 = sld [smem:[#allocation4 + $0x1a]] }
  0x40   :  { %s3200_s16 = smov (%p258_p9, %s2598_s16), 32  ;;  %s2669_s13 = sld [smem:[#allocation4 + $0x22]] }
  0x41   :  { %s3202_s17 = smov (%p267_p10, %s2600_s17), 32  ;;  %s261_s24 = scalar_lea.vmem %s3159_s1, %s3200_s16 }
  0x42   :  { %2098 = vmatpush3.bf16.msra.mxu1 %v2465_v17  ;;  %v262_v42 = vld [vmem:[%s261_s24] sm:$0x1]  ;;  %s270_s18 = scalar_lea.vmem %s3159_s1, %s3202_s17  ;;  %s1481_s16 = sld [smem:[#allocation4 + $0xa]] }
  0x43   :  { %2099 = vmatprep.subr.bf16.mxu1 %v2319_v3  ;;  %263 = vst [vmem:[#allocation3 + $0x6] sm:$0x1] %v262_v42  ;;  %v271_v43 = vld [vmem:[%s270_s18] sm:$0x1]  ;;  %s2665_s17 = sld [smem:[#allocation4 + $0x12]]  ;;  %s2742_s21 = sld [smem:[#allocation4 + $0x1b]] }
  0x44   :  { %272 = vst [vmem:[#allocation3 + $0x7] sm:$0x1] %v271_v43  ;;  %s2671_s20 = sld [smem:[#allocation4 + $0x2a]]  ;;  %p349_p11 = scmp.ge.s32.totalorder %s1479_s12, 0 }
  0x45   :  { %s2675_s14 = sld [smem:[#allocation4 + $0x3a]]  ;;  %p350_p12 = scmp.lt.s32.totalorder %s1479_s12, 32 }
  0x46   :  { %2101 = vmatpush3.bf16.msra.mxu1 %v2493_v22  ;;  %p376_p6 = scmp.ge.s32.totalorder %s2667_s19, 0  ;;  %p377_p7 = scmp.lt.s32.totalorder %s2667_s19, 32 }
  0x47   :  { %2102 = vmatprep.subr.bf16.mxu1 %v2319_v3  ;;  %p351_p1 = pnand %p350_p12, %p349_p11  ;;  %p385_p8 = scmp.ge.s32.totalorder %s2669_s13, 0 }
  0x48   :  { %p358_p13 = scmp.ge.s32.totalorder %s1481_s16, 0  ;;  %p359_p0 = scmp.lt.s32.totalorder %s1481_s16, 32 }
  0x49   :  { %p367_p2 = scmp.ge.s32.totalorder %s2665_s17, 0  ;;  %p368_p4 = scmp.lt.s32.totalorder %s2665_s17, 32 }
  0x4a   :  { %2104 = vmatpush3.bf16.msra.mxu1 %v2525_v25  ;;  %p360_p3 = pnand %p359_p0, %p358_p13  ;;  %s3204_s12 = smov (%p351_p1, %s1479_s12), 32 }
  0x4b   :  { %2105 = vmatprep.subr.bf16.mxu1 %v2319_v3  ;;  %s354_s27 = scalar_lea.vmem %s3159_s1, %s3204_s12  ;;  %p369_p5 = pnand %p368_p4, %p367_p2  ;;  %v273_v48 = vld [vmem:[#allocation3] sm:$0xff] }
  0x4c   :  { %s3206_s16 = smov (%p360_p3, %s1481_s16), 32  ;;  %v355_v49 = vld [vmem:[%s354_s27] sm:$0x1]  ;;  %p386_p9 = scmp.lt.s32.totalorder %s2669_s13, 32 }
  0x4d   :  { %s363_s22 = scalar_lea.vmem %s3159_s1, %s3206_s16  ;;  %356 = vst [vmem:[#allocation3] sm:$0x1] %v355_v49  ;;  %s3208_s17 = smov (%p369_p5, %s2665_s17), 32 }
  0x4e   :  { %2107 = vmatpush3.bf16.msra.mxu1 %v2550_v30  ;;  %v364_v50 = vld [vmem:[%s363_s22] sm:$0x1]  ;;  %s372_s8 = scalar_lea.vmem %s3159_s1, %s3208_s17  ;;  %p378_p10 = pnand %p377_p7, %p376_p6 }
  0x4f   :  { %2132 = vmatprep.subr.bf16.mxu1 %v2319_v3  ;;  %365 = vst [vmem:[#allocation3 + $0x1] sm:$0x1] %v364_v50  ;;  %v373_v51 = vld [vmem:[%s372_s8] sm:$0x1]  ;;  %p394_p11 = scmp.ge.s32.totalorder %s2671_s20, 0  ;;  %p387_p12 = pnand %p386_p9, %p385_p8 }
  0x50   :  { %374 = vst [vmem:[#allocation3 + $0x2] sm:$0x1] %v373_v51  ;;  %p395_p13 = scmp.lt.s32.totalorder %s2671_s20, 32  ;;  %s3210_s19 = smov (%p378_p10, %s2667_s19), 32 }
  0x51   :  { %s3212_s13 = smov (%p387_p12, %s2669_s13), 32  ;;  %s381_s0 = scalar_lea.vmem %s3159_s1, %s3210_s19 }
  0x52   :  { %p396_p0 = pnand %p395_p13, %p394_p11  ;;  %v382_v52 = vld [vmem:[%s381_s0] sm:$0x1]  ;;  %s390_s24 = scalar_lea.vmem %s3159_s1, %s3212_s13 }
  0x53   :  { %p403_p1 = scmp.ge.s32.totalorder %s2673_s25, 0  ;;  %383 = vst [vmem:[#allocation3 + $0x3] sm:$0x1] %v382_v52  ;;  %v391_v53 = vld [vmem:[%s390_s24] sm:$0x1]  ;;  %p404_p2 = scmp.lt.s32.totalorder %s2673_s25, 32 }
  0x54   :  { %s3214_s20 = smov (%p396_p0, %s2671_s20), 32  ;;  %392 = vst [vmem:[#allocation3 + $0x4] sm:$0x1] %v391_v53  ;;  %p412_p3 = scmp.ge.s32.totalorder %s2675_s14, 0  ;;  %v1241_v52 = vld [vmem:[%s3162_s4 + $0x10] sm:$0xff]  ;;  %v1242_v53 = vld [vmem:[%s3162_s4 + $0x18] sm:$0xff] }
  0x55   :  { %s399_s18 = scalar_lea.vmem %s3159_s1, %s3214_s20  ;;  %p413_p4 = scmp.lt.s32.totalorder %s2675_s14, 32 }
  0x56   :  { %v400_v54 = vld [vmem:[%s399_s18] sm:$0x1]  ;;  %p405_p5 = pnand %p404_p2, %p403_p1  ;;  %s1495_s20 = sld [smem:[#allocation4 + $0x3]] }
  0x57   :  { %401 = vst [vmem:[#allocation3 + $0x5] sm:$0x1] %v400_v54  ;;  %p414_p6 = pnand %p413_p4, %p412_p3  ;;  %s2744_s27 = sld [smem:[#allocation4 + $0x23]]  ;;  %v2256_v54 = vpack.c.bf16 %v1242_v53, %v1241_v52 }
  0x58   :  { %s3216_s25 = smov (%p405_p5, %s2673_s25), 32  ;;  %s2746_s28 = sld [smem:[#allocation4 + $0x2b]] }
  0x59   :  { %s3218_s14 = smov (%p414_p6, %s2675_s14), 32  ;;  %s408_s17 = scalar_lea.vmem %s3159_s1, %s3216_s25 }
  0x5a   :  { %v409_v55 = vld [vmem:[%s408_s17] sm:$0x1]  ;;  %s417_s26 = scalar_lea.vmem %s3159_s1, %s3218_s14  ;;  %s1497_s25 = sld [smem:[#allocation4 + $0xb]] }
  0x5b   :  { %410 = vst [vmem:[#allocation3 + $0x6] sm:$0x1] %v409_v55  ;;  %v418_v56 = vld [vmem:[%s417_s26] sm:$0x1]  ;;  %s2740_s14 = sld [smem:[#allocation4 + $0x13]]  ;;  %p523_p2 = scmp.ge.s32.totalorder %s2742_s21, 0 }
  0x5c   :  { %419 = vst [vmem:[#allocation3 + $0x7] sm:$0x1] %v418_v56  ;;  %s2750_s22 = sld [smem:[#allocation4 + $0x3b]]  ;;  %p496_p7 = scmp.ge.s32.totalorder %s1495_s20, 0  ;;  %v1243_v56 = vld [vmem:[%s3162_s4 + $0x20] sm:$0xff] }
  0x5d   :  { %p497_p8 = scmp.lt.s32.totalorder %s1495_s20, 32  ;;  %p524_p3 = scmp.lt.s32.totalorder %s2742_s21, 32 }
  0x5e   :  { %p532_p4 = scmp.ge.s32.totalorder %s2744_s27, 0  ;;  %p533_p5 = scmp.lt.s32.totalorder %s2744_s27, 32 }
  0x5f   :  { %p498_p11 = pnand %p497_p8, %p496_p7  ;;  %p525_p6 = pnand %p524_p3, %p523_p2 }
  0x60   :  { %p505_p9 = scmp.ge.s32.totalorder %s1497_s25, 0  ;;  %p506_p10 = scmp.lt.s32.totalorder %s1497_s25, 32 }
  0x61   :  { %p514_p12 = scmp.ge.s32.totalorder %s2740_s14, 0  ;;  %p515_p0 = scmp.lt.s32.totalorder %s2740_s14, 32 }
  0x62   :  { %p507_p13 = pnand %p506_p10, %p505_p9  ;;  %s3220_s20 = smov (%p498_p11, %s1495_s20), 32 }
  0x63   :  { %s501_s8 = scalar_lea.vmem %s3159_s1, %s3220_s20  ;;  %p516_p1 = pnand %p515_p0, %p514_p12  ;;  %v420_v61 = vld [vmem:[#allocation3] sm:$0xff] }
  0x64   :  { %s3222_s25 = smov (%p507_p13, %s1497_s25), 32  ;;  %v502_v62 = vld [vmem:[%s501_s8] sm:$0x1]  ;;  %p541_p7 = scmp.ge.s32.totalorder %s2746_s28, 0 }
  0x65   :  { %s510_s0 = scalar_lea.vmem %s3159_s1, %s3222_s25  ;;  %503 = vst [vmem:[#allocation3] sm:$0x1] %v502_v62  ;;  %s3224_s14 = smov (%p516_p1, %s2740_s14), 32 }
  0x66   :  { %v511_v63 = vld [vmem:[%s510_s0] sm:$0x1]  ;;  %s519_s24 = scalar_lea.vmem %s3159_s1, %s3224_s14  ;;  %p534_p8 = pnand %p533_p5, %p532_p4 }
  0x67   :  { %512 = vst [vmem:[#allocation3 + $0x1] sm:$0x1] %v511_v63  ;;  %v520_v0 = vld [vmem:[%s519_s24] sm:$0x1]  ;;  %p542_p9 = scmp.lt.s32.totalorder %s2746_s28, 32  ;;  %s3226_s21 = smov (%p525_p6, %s2742_s21), 32 }
  0x68   :  { %521 = vst [vmem:[#allocation3 + $0x2] sm:$0x1] %v520_v0  ;;  %s3228_s27 = smov (%p534_p8, %s2744_s27), 32  ;;  %s528_s18 = scalar_lea.vmem %s3159_s1, %s3226_s21  ;;  %v1247_v63 = vld [vmem:[%s3162_s4 + $0x40] sm:$0xff] }
  0x69   :  { %p543_p10 = pnand %p542_p9, %p541_p7  ;;  %v529_v1 = vld [vmem:[%s528_s18] sm:$0x1]  ;;  %s537_s17 = scalar_lea.vmem %s3159_s1, %s3228_s27 }
  0x6a   :  { %p550_p11 = scmp.ge.s32.totalorder %s2748_s2, 0  ;;  %530 = vst [vmem:[#allocation3 + $0x3] sm:$0x1] %v529_v1  ;;  %v538_v2 = vld [vmem:[%s537_s17] sm:$0x1]  ;;  %p551_p12 = scmp.lt.s32.totalorder %s2748_s2, 32 }
  0x6b   :  { %s3230_s28 = smov (%p543_p10, %s2746_s28), 32  ;;  %539 = vst [vmem:[#allocation3 + $0x4] sm:$0x1] %v538_v2  ;;  %p559_p13 = scmp.ge.s32.totalorder %s2750_s22, 0  ;;  %v1249_v1 = vld [vmem:[%s3162_s4 + $0x50] sm:$0xff]  ;;  %v1250_v2 = vld [vmem:[%s3162_s4 + $0x58] sm:$0xff] }
  0x6c   :  { %s546_s26 = scalar_lea.vmem %s3159_s1, %s3230_s28  ;;  %p560_p0 = scmp.lt.s32.totalorder %s2750_s22, 32 }
  0x6d   :  { %v547_v5 = vld [vmem:[%s546_s26] sm:$0x1]  ;;  %p552_p1 = pnand %p551_p12, %p550_p11  ;;  %s1511_s28 = sld [smem:[#allocation4 + $0x4]] }
  0x6e   :  { %548 = vst [vmem:[#allocation3 + $0x5] sm:$0x1] %v547_v5  ;;  %p561_p2 = pnand %p560_p0, %p559_p13  ;;  %s2817_s30 = sld [smem:[#allocation4 + $0x1c]]  ;;  %v2272_v5 = vpack.c.bf16 %v1250_v2, %v1249_v1 }
  0x6f   :  { %s3232_s2 = smov (%p552_p1, %s2748_s2), 32  ;;  %s2819_s8 = sld [smem:[#allocation4 + $0x24]] }
  0x70   :  { %s3234_s22 = smov (%p561_p2, %s2750_s22), 32  ;;  %s555_s14 = scalar_lea.vmem %s3159_s1, %s3232_s2 }
  0x71   :  { %v556_v8 = vld [vmem:[%s555_s14] sm:$0x1]  ;;  %s564_s29 = scalar_lea.vmem %s3159_s1, %s3234_s22  ;;  %s1513_s2 = sld [smem:[#allocation4 + $0xc]] }
  0x72   :  { %557 = vst [vmem:[#allocation3 + $0x6] sm:$0x1] %v556_v8  ;;  %v565_v9 = vld [vmem:[%s564_s29] sm:$0x1]  ;;  %s2815_s22 = sld [smem:[#allocation4 + $0x14]]  ;;  %s2891_s23 = sld [smem:[#allocation4 + $0x1d]] }
  0x73   :  { %566 = vst [vmem:[#allocation3 + $0x7] sm:$0x1] %v565_v9  ;;  %s2821_s15 = sld [smem:[#allocation4 + $0x2c]]  ;;  %p643_p3 = scmp.ge.s32.totalorder %s1511_s28, 0  ;;  %v1251_v8 = vld [vmem:[%s3162_s4 + $0x60] sm:$0xff]  ;;  %v1252_v9 = vld [vmem:[%s3162_s4 + $0x68] sm:$0xff] }
  0x74   :  { %s2823_s9 = sld [smem:[#allocation4 + $0x34]]  ;;  %p644_p4 = scmp.lt.s32.totalorder %s1511_s28, 32 }
  0x75   :  { %s2825_s0 = sld [smem:[#allocation4 + $0x3c]]  ;;  %p670_p12 = scmp.ge.s32.totalorder %s2817_s30, 0 }
  0x76   :  { %p645_p7 = pnand %p644_p4, %p643_p3  ;;  %p671_p13 = scmp.lt.s32.totalorder %s2817_s30, 32 }
  0x77   :  { %p652_p5 = scmp.ge.s32.totalorder %s1513_s2, 0  ;;  %p653_p6 = scmp.lt.s32.totalorder %s1513_s2, 32 }
  0x78   :  { %p661_p8 = scmp.ge.s32.totalorder %s2815_s22, 0  ;;  %p662_p10 = scmp.lt.s32.totalorder %s2815_s22, 32 }
  0x79   :  { %p654_p9 = pnand %p653_p6, %p652_p5  ;;  %s3236_s28 = smov (%p645_p7, %s1511_s28), 32 }
  0x7a   :  { %s648_s24 = scalar_lea.vmem %s3159_s1, %s3236_s28  ;;  %p663_p11 = pnand %p662_p10, %p661_p8  ;;  %v567_v16 = vld [vmem:[#allocation3] sm:$0xff] }
  0x7b   :  { %s3238_s2 = smov (%p654_p9, %s1513_s2), 32  ;;  %v649_v18 = vld [vmem:[%s648_s24] sm:$0x1]  ;;  %p679_p0 = scmp.ge.s32.totalorder %s2819_s8, 0 }
  0x7c   :  { %s657_s18 = scalar_lea.vmem %s3159_s1, %s3238_s2  ;;  %650 = vst [vmem:[#allocation3] sm:$0x1] %v649_v18  ;;  %s3240_s22 = smov (%p663_p11, %s2815_s22), 32 }
  0x7d   :  { %v658_v19 = vld [vmem:[%s657_s18] sm:$0x1]  ;;  %s666_s17 = scalar_lea.vmem %s3159_s1, %s3240_s22  ;;  %p680_p1 = scmp.lt.s32.totalorder %s2819_s8, 32 }
  0x7e   :  { %659 = vst [vmem:[#allocation3 + $0x1] sm:$0x1] %v658_v19  ;;  %v667_v20 = vld [vmem:[%s666_s17] sm:$0x1]  ;;  %p672_p2 = pnand %p671_p13, %p670_p12  ;;  %p688_p3 = scmp.ge.s32.totalorder %s2821_s15, 0 }
  0x7f   :  { %668 = vst [vmem:[#allocation3 + $0x2] sm:$0x1] %v667_v20  ;;  %p681_p4 = pnand %p680_p1, %p679_p0  ;;  %p689_p5 = scmp.lt.s32.totalorder %s2821_s15, 32 }
  0x80   :  { %s3242_s30 = smov (%p672_p2, %s2817_s30), 32  ;;  %p697_p7 = scmp.ge.s32.totalorder %s2823_s9, 0 }
  0x81   :  { %s3244_s8 = smov (%p681_p4, %s2819_s8), 32  ;;  %s675_s26 = scalar_lea.vmem %s3159_s1, %s3242_s30 }
  0x82   :  { %p690_p6 = pnand %p689_p5, %p688_p3  ;;  %v676_v21 = vld [vmem:[%s675_s26] sm:$0x1]  ;;  %s684_s14 = scalar_lea.vmem %s3159_s1, %s3244_s8 }
  0x83   :  { %677 = vst [vmem:[#allocation3 + $0x3] sm:$0x1] %v676_v21  ;;  %v685_v23 = vld [vmem:[%s684_s14] sm:$0x1]  ;;  %p698_p8 = scmp.lt.s32.totalorder %s2823_s9, 32  ;;  %p706_p9 = scmp.ge.s32.totalorder %s2825_s0, 0 }
  0x84   :  { %s3246_s15 = smov (%p690_p6, %s2821_s15), 32  ;;  %686 = vst [vmem:[#allocation3 + $0x4] sm:$0x1] %v685_v23  ;;  %p707_p10 = scmp.lt.s32.totalorder %s2825_s0, 32 }
  0x85   :  { %s693_s29 = scalar_lea.vmem %s3159_s1, %s3246_s15  ;;  %p699_p11 = pnand %p698_p8, %p697_p7 }
  0x86   :  { %v694_v24 = vld [vmem:[%s693_s29] sm:$0x1]  ;;  %p708_p12 = pnand %p707_p10, %p706_p9  ;;  %s1527_s15 = sld [smem:[#allocation4 + $0x5]] }
  0x87   :  { %695 = vst [vmem:[#allocation3 + $0x5] sm:$0x1] %v694_v24  ;;  %s3248_s9 = smov (%p699_p11, %s2823_s9), 32  ;;  %s2893_s24 = sld [smem:[#allocation4 + $0x25]] }
  0x88   :  { %s3250_s0 = smov (%p708_p12, %s2825_s0), 32  ;;  %s702_s22 = scalar_lea.vmem %s3159_s1, %s3248_s9 }
  0x89   :  { %v703_v26 = vld [vmem:[%s702_s22] sm:$0x1]  ;;  %s711_s3 = scalar_lea.vmem %s3159_s1, %s3250_s0  ;;  %s1529_s9 = sld [smem:[#allocation4 + $0xd]] }
  0x8a   :  { %704 = vst [vmem:[#allocation3 + $0x6] sm:$0x1] %v703_v26  ;;  %v712_v27 = vld [vmem:[%s711_s3] sm:$0x1]  ;;  %s2889_s0 = sld [smem:[#allocation4 + $0x15]]  ;;  %p817_p8 = scmp.ge.s32.totalorder %s2891_s23, 0 }
  0x8b   :  { %713 = vst [vmem:[#allocation3 + $0x7] sm:$0x1] %v712_v27  ;;  %s2895_s10 = sld [smem:[#allocation4 + $0x2d]]  ;;  %p818_p9 = scmp.lt.s32.totalorder %s2891_s23, 32 }
  0x8c   :  { %s2897_s11 = sld [smem:[#allocation4 + $0x35]]  ;;  %p790_p13 = scmp.ge.s32.totalorder %s1527_s15, 0 }
  0x8d   :  { %s2899_s18 = sld [smem:[#allocation4 + $0x3d]]  ;;  %p791_p0 = scmp.lt.s32.totalorder %s1527_s15, 32 }
  0x8e   :  { %p826_p10 = scmp.ge.s32.totalorder %s2893_s24, 0  ;;  %p827_p11 = scmp.lt.s32.totalorder %s2893_s24, 32 }
  0x8f   :  { %p799_p1 = scmp.ge.s32.totalorder %s1529_s9, 0  ;;  %p800_p2 = scmp.lt.s32.totalorder %s1529_s9, 32 }
  0x90   :  { %p792_p3 = pnand %p791_p0, %p790_p13  ;;  %p808_p4 = scmp.ge.s32.totalorder %s2889_s0, 0 }
  0x91   :  { %p801_p5 = pnand %p800_p2, %p799_p1  ;;  %p809_p6 = scmp.lt.s32.totalorder %s2889_s0, 32 }
  0x92   :  { %s3252_s15 = smov (%p792_p3, %s1527_s15), 32  ;;  %v714_v33 = vld [vmem:[#allocation3] sm:$0xff]  ;;  %p819_p12 = pnand %p818_p9, %p817_p8 }
  0x93   :  { %s3254_s9 = smov (%p801_p5, %s1529_s9), 32  ;;  %s795_s17 = scalar_lea.vmem %s3159_s1, %s3252_s15 }
  0x94   :  { %p810_p7 = pnand %p809_p6, %p808_p4  ;;  %v796_v34 = vld [vmem:[%s795_s17] sm:$0x1]  ;;  %s804_s26 = scalar_lea.vmem %s3159_s1, %s3254_s9 }
  0x95   :  { %797 = vst [vmem:[#allocation3] sm:$0x1] %v796_v34  ;;  %p835_p13 = scmp.ge.s32.totalorder %s2895_s10, 0  ;;  %p828_p0 = pnand %p827_p11, %p826_p10 }
  0x96   :  { %s3256_s0 = smov (%p810_p7, %s2889_s0), 32  ;;  %p836_p1 = scmp.lt.s32.totalorder %s2895_s10, 32 }
  0x97   :  { %s813_s14 = scalar_lea.vmem %s3159_s1, %s3256_s0  ;;  %s3258_s23 = smov (%p819_p12, %s2891_s23), 32 }
  0x98   :  { %v814_v36 = vld [vmem:[%s813_s14] sm:$0x1]  ;;  %s3260_s24 = smov (%p828_p0, %s2893_s24), 32  ;;  %s822_s29 = scalar_lea.vmem %s3159_s1, %s3258_s23 }
  0x99   :  { %815 = vst [vmem:[#allocation3 + $0x2] sm:$0x1] %v814_v36  ;;  %p837_p2 = pnand %p836_p1, %p835_p13  ;;  %v823_v37 = vld [vmem:[%s822_s29] sm:$0x1]  ;;  %s831_s22 = scalar_lea.vmem %s3159_s1, %s3260_s24 }
  0x9a   :  { %p844_p3 = scmp.ge.s32.totalorder %s2897_s11, 0  ;;  %824 = vst [vmem:[#allocation3 + $0x3] sm:$0x1] %v823_v37  ;;  %v832_v38 = vld [vmem:[%s831_s22] sm:$0x1]  ;;  %p845_p4 = scmp.lt.s32.totalorder %s2897_s11, 32 }
  0x9b   :  { %s3262_s10 = smov (%p837_p2, %s2895_s10), 32  ;;  %833 = vst [vmem:[#allocation3 + $0x4] sm:$0x1] %v832_v38  ;;  %p853_p5 = scmp.ge.s32.totalorder %s2899_s18, 0 }
  0x9c   :  { %s840_s3 = scalar_lea.vmem %s3159_s1, %s3262_s10  ;;  %p854_p6 = scmp.lt.s32.totalorder %s2899_s18, 32 }
  0x9d   :  { %v841_v39 = vld [vmem:[%s840_s3] sm:$0x1]  ;;  %p846_p7 = pnand %p845_p4, %p844_p3  ;;  %s1543_s17 = sld [smem:[#allocation4 + $0x6]] }
  0x9e   :  { %842 = vst [vmem:[#allocation3 + $0x5] sm:$0x1] %v841_v39  ;;  %p855_p8 = pnand %p854_p6, %p853_p5  ;;  %s1545_s19 = sld [smem:[#allocation4 + $0xe]] }
  0x9f   :  { %s3264_s11 = smov (%p846_p7, %s2897_s11), 32  ;;  %s2972_s13 = sld [smem:[#allocation4 + $0x16]] }
  0xa0   :  { %s3266_s18 = smov (%p855_p8, %s2899_s18), 32  ;;  %s849_s0 = scalar_lea.vmem %s3159_s1, %s3264_s11 }
  0xa1   :  { %v850_v40 = vld [vmem:[%s849_s0] sm:$0x1]  ;;  %s858_s12 = scalar_lea.vmem %s3159_s1, %s3266_s18  ;;  %s2976_s20 = sld [smem:[#allocation4 + $0x26]] }
  0xa2   :  { %851 = vst [vmem:[#allocation3 + $0x6] sm:$0x1] %v850_v40  ;;  %v859_v41 = vld [vmem:[%s858_s12] sm:$0x1]  ;;  %s2978_s25 = sld [smem:[#allocation4 + $0x2e]]  ;;  %s1561_s2 = sld [smem:[#allocation4 + $0xf]] }
  0xa3   :  { %860 = vst [vmem:[#allocation3 + $0x7] sm:$0x1] %v859_v41  ;;  %s2980_s14 = sld [smem:[#allocation4 + $0x36]]  ;;  %p937_p9 = scmp.ge.s32.totalorder %s1543_s17, 0 }
  0xa4   :  { %s2982_s21 = sld [smem:[#allocation4 + $0x3e]]  ;;  %p938_p10 = scmp.lt.s32.totalorder %s1543_s17, 32 }
  0xa5   :  { %p946_p11 = scmp.ge.s32.totalorder %s1545_s19, 0  ;;  %p947_p12 = scmp.lt.s32.totalorder %s1545_s19, 32 }
  0xa6   :  { %p939_p13 = pnand %p938_p10, %p937_p9  ;;  %p955_p0 = scmp.ge.s32.totalorder %s2972_s13, 0 }
  0xa7   :  { %p948_p1 = pnand %p947_p12, %p946_p11  ;;  %p956_p2 = scmp.lt.s32.totalorder %s2972_s13, 32 }
  0xa8   :  { %s3268_s17 = smov (%p939_p13, %s1543_s17), 32  ;;  %p973_p6 = scmp.ge.s32.totalorder %s2976_s20, 0 }
  0xa9   :  { %s3270_s19 = smov (%p948_p1, %s1545_s19), 32  ;;  %s942_s28 = scalar_lea.vmem %s3159_s1, %s3268_s17 }
  0xaa   :  { %p957_p3 = pnand %p956_p2, %p955_p0  ;;  %s951_s30 = scalar_lea.vmem %s3159_s1, %s3270_s19 }
  0xab   :  { %p974_p7 = scmp.lt.s32.totalorder %s2976_s20, 32  ;;  %p982_p9 = scmp.ge.s32.totalorder %s2978_s25, 0 }
  0xac   :  { %s3272_s13 = smov (%p957_p3, %s2972_s13), 32  ;;  %p983_p11 = scmp.lt.s32.totalorder %s2978_s25, 32 }
  0xad   :  { %s960_s15 = scalar_lea.vmem %s3159_s1, %s3272_s13  ;;  %p975_p10 = pnand %p974_p7, %p973_p6 }
  0xae   :  { %p984_p12 = pnand %p983_p11, %p982_p9  ;;  %p991_p13 = scmp.ge.s32.totalorder %s2980_s14, 0 }
  0xaf   :  { %s3276_s20 = smov (%p975_p10, %s2976_s20), 32  ;;  %p992_p0 = scmp.lt.s32.totalorder %s2980_s14, 32 }
  0xb0   :  { %s978_s10 = scalar_lea.vmem %s3159_s1, %s3276_s20  ;;  %s3278_s25 = smov (%p984_p12, %s2978_s25), 32 }
  0xb1   :  { %p1000_p1 = scmp.ge.s32.totalorder %s2982_s21, 0  ;;  %s987_s16 = scalar_lea.vmem %s3159_s1, %s3278_s25 }
  0xb2   :  { %p1001_p2 = scmp.lt.s32.totalorder %s2982_s21, 32  ;;  %p993_p3 = pnand %p992_p0, %p991_p13 }
  0xb3   :  { %s3078_s22 = sld [smem:[#allocation4 + $0x27]]  ;;  %p1093_p7 = scmp.ge.s32.totalorder %s1561_s2, 0 }
  0xb4   :  { %s3280_s14 = smov (%p993_p3, %s2980_s14), 32  ;;  %s3084_s8 = sld [smem:[#allocation4 + $0x3f]] }
  0xb5   :  { %s996_s13 = scalar_lea.vmem %s3159_s1, %s3280_s14  ;;  %s3074_s14 = sld [smem:[#allocation4 + $0x17]] }
  0xb9   :  { %p1121_p3 = scmp.lt.s32.totalorder %s3078_s22, 32 }
  0xbb   :  { %p1102_p10 = scmp.ge.s32.totalorder %s3074_s14, 0  ;;  %p1103_p12 = scmp.lt.s32.totalorder %s3074_s14, 32 }
  0xbd   :  { %p1104_p13 = pnand %p1103_p12, %p1102_p10  ;;  %p1148_p12 = scmp.lt.s32.totalorder %s3084_s8, 32 }
  0xbf   :  { %s3288_s14 = smov (%p1104_p13, %s3074_s14), 32 }
  0xc0   :  { %s1107_s11 = scalar_lea.vmem %s3159_s1, %s3288_s14 }
  0xc1   :  { %v1108_v19 = vld [vmem:[%s1107_s11] sm:$0x1] }
 0x104   :  { %v194_v44 = vpop.f32.mrb[0].mxu1 }
 0x105   :  { %v198_v45 = vadd.f32 %v194_v44, %v127_v35  ;;  %v1770_v46 = vpop.f32.mrb[1].mxu1  ;;  %v805_v35 = vld [vmem:[%s804_s26] sm:$0x1]  ;;  %s2974_s26 = sld [smem:[#allocation4 + $0x1e]] }
 0x106   :  { %806 = vst [vmem:[#allocation3 + $0x1] sm:$0x1] %v805_v35  ;;  %v997_v46 = vld [vmem:[%s996_s13] sm:$0x1] }
 0x107   :  { %2288 = vtanh.f32 %v198_v45 }
 0x10b   :  { %p964_p4 = scmp.ge.s32.totalorder %s2974_s26, 0  ;;  %p965_p5 = scmp.lt.s32.totalorder %s2974_s26, 32 }
 0x10d   :  { %p966_p8 = pnand %p965_p5, %p964_p4  ;;  %p1002_p4 = pnand %p1001_p2, %p1000_p1 }
 0x10e   :  { %p1120_p2 = scmp.ge.s32.totalorder %s3078_s22, 0 }
 0x10f   :  { %s3274_s26 = smov (%p966_p8, %s2974_s26), 32  ;;  %s3282_s21 = smov (%p1002_p4, %s2982_s21), 32 }
 0x110   :  { %s969_s23 = scalar_lea.vmem %s3159_s1, %s3274_s26  ;;  %s1005_s27 = scalar_lea.vmem %s3159_s1, %s3282_s21 }
 0x111   :  { %v2644_v47 = vpop.eup %2288  ;;  %s3080_s21 = sld [smem:[#allocation4 + $0x2f]]  ;;  %p1094_p8 = scmp.lt.s32.totalorder %s1561_s2, 32 }
 0x112   :  { %1804 = vmatmul.mubr.f32.vlgmr.msra.gmra.mrb[2].mxu1 %v2644_v47 }
 0x113   :  { %2134 = vmatpush3.bf16.msra.mxu1 %v2375_v4  ;;  %1873 = vmatprep.mubr.msk.f32.mxu1 %vm2320_vm0, %v2321_v6  ;;  %p1095_p11 = pnand %p1094_p8, %p1093_p7 }
 0x114   :  { %2135 = vmatprep.subr.bf16.mxu1 %v2319_v3 }
 0x115   :  { %s3286_s2 = smov (%p1095_p11, %s1561_s2), 32  ;;  %p1147_p11 = scmp.ge.s32.totalorder %s3084_s8, 0 }
 0x116   :  { %s1098_s24 = scalar_lea.vmem %s3159_s1, %s3286_s2 }
 0x117   :  { %2137 = vmatpush3.bf16.msra.mxu1 %v2390_v7  ;;  %v1099_v18 = vld [vmem:[%s1098_s24] sm:$0x1]  ;;  %p1130_p7 = scmp.lt.s32.totalorder %s3080_s21, 32 }
 0x118   :  { %2138 = vmatprep.subr.bf16.mxu1 %v2319_v3 }
 0x11b   :  { %2140 = vmatpush3.bf16.msra.mxu1 %v2414_v10 }
 0x11c   :  { %2141 = vmatprep.subr.bf16.mxu1 %v2319_v3 }
 0x11f   :  { %2143 = vmatpush3.bf16.msra.mxu1 %v2436_v13 }
 0x120   :  { %2144 = vmatprep.subr.bf16.mxu1 %v2319_v3 }
 0x123   :  { %2146 = vmatpush3.bf16.msra.mxu1 %v2465_v17 }
 0x124   :  { %2147 = vmatprep.subr.bf16.mxu1 %v2319_v3 }
 0x127   :  { %2149 = vmatpush3.bf16.msra.mxu1 %v2493_v22 }
 0x128   :  { %2150 = vmatprep.subr.bf16.mxu1 %v2319_v3 }
 0x12b   :  { %2152 = vmatpush3.bf16.msra.mxu1 %v2525_v25 }
 0x12c   :  { %2153 = vmatprep.subr.bf16.mxu1 %v2319_v3 }
 0x12f   :  { %2155 = vmatpush3.bf16.msra.mxu1 %v2550_v30 }
 0x130   :  { %2180 = vmatprep.subr.bf16.mxu1 %v2319_v3 }
 0x1e5   :  { %v340_v57 = vpop.f32.mrb[2].mxu1 }
 0x1e6   :  { %v344_v58 = vadd.f32 %v340_v57, %v273_v48  ;;  %v1805_v59 = vpop.f32.mrb[3].mxu1  ;;  %v1006_v48 = vld [vmem:[%s1005_s27] sm:$0x1]  ;;  %v1244_v57 = vld [vmem:[%s3162_s4 + $0x28] sm:$0xff] }
 0x1e7   :  { %v1245_v59 = vld [vmem:[%s3162_s4 + $0x30] sm:$0xff] }
 0x1e8   :  { %2290 = vtanh.f32 %v344_v58  ;;  %v2260_v58 = vpack.c.bf16 %v1244_v57, %v1243_v56 }
 0x1f2   :  { %v2719_v60 = vpop.eup %2290 }
 0x1f3   :  { %1839 = vmatmul.mubr.f32.vlgmr.msra.gmra.mrb[0].mxu0 %v2719_v60 }
 0x1f4   :  { %2158 = vmatpush3.bf16.msra.mxu0 %v2375_v4  ;;  %1908 = vmatprep.mubr.msk.f32.mxu0 %vm2320_vm0, %v2321_v6 }
 0x1f5   :  { %2159 = vmatprep.subr.bf16.mxu0 %v2319_v3 }
 0x1f8   :  { %2161 = vmatpush3.bf16.msra.mxu0 %v2390_v7 }
 0x1f9   :  { %2162 = vmatprep.subr.bf16.mxu0 %v2319_v3 }
 0x1fc   :  { %2164 = vmatpush3.bf16.msra.mxu0 %v2414_v10 }
 0x1fd   :  { %2165 = vmatprep.subr.bf16.mxu0 %v2319_v3 }
 0x200   :  { %2167 = vmatpush3.bf16.msra.mxu0 %v2436_v13 }
 0x201   :  { %2168 = vmatprep.subr.bf16.mxu0 %v2319_v3 }
 0x204   :  { %2170 = vmatpush3.bf16.msra.mxu0 %v2465_v17 }
 0x205   :  { %2171 = vmatprep.subr.bf16.mxu0 %v2319_v3 }
 0x208   :  { %2173 = vmatpush3.bf16.msra.mxu0 %v2493_v22 }
 0x209   :  { %2174 = vmatprep.subr.bf16.mxu0 %v2319_v3 }
 0x20c   :  { %2176 = vmatpush3.bf16.msra.mxu0 %v2525_v25 }
 0x20d   :  { %2177 = vmatprep.subr.bf16.mxu0 %v2319_v3 }
 0x210   :  { %2179 = vmatpush3.bf16.msra.mxu0 %v2550_v30 }
 0x211   :  { %2204 = vmatprep.subr.bf16.mxu0 %v2319_v3 }
 0x2c6   :  { %v487_v11 = vpop.f32.mrb[0].mxu0 }
 0x2c7   :  { %v491_v12 = vadd.f32 %v487_v11, %v420_v61  ;;  %v1840_v14 = vpop.f32.mrb[1].mxu0  ;;  %v1246_v61 = vld [vmem:[%s3162_s4 + $0x38] sm:$0xff]  ;;  %v2276_v11 = vpack.c.bf16 %v1252_v9, %v1251_v8 }
 0x2c8   :  { %v2264_v62 = vpack.c.bf16 %v1246_v61, %v1245_v59  ;;  %v1254_v14 = vld [vmem:[%s3162_s4 + $0x78] sm:$0xff] }
 0x2c9   :  { %2292 = vtanh.f32 %v491_v12  ;;  %v1253_v12 = vld [vmem:[%s3162_s4 + $0x70] sm:$0xff] }
 0x2d3   :  { %v2794_v15 = vpop.eup %2292 }
 0x2d4   :  { %1874 = vmatmul.mubr.f32.vlgmr.msra.gmra.mrb[4].mxu1 %v2794_v15 }
 0x2d5   :  { %2182 = vmatpush3.bf16.msra.mxu1 %v2375_v4  ;;  %1943 = vmatprep.mubr.msk.f32.mxu1 %vm2320_vm0, %v2321_v6 }
 0x2d6   :  { %2183 = vmatprep.subr.bf16.mxu1 %v2319_v3 }
 0x2d9   :  { %2185 = vmatpush3.bf16.msra.mxu1 %v2390_v7 }
 0x2da   :  { %2186 = vmatprep.subr.bf16.mxu1 %v2319_v3 }
 0x2dd   :  { %2188 = vmatpush3.bf16.msra.mxu1 %v2414_v10 }
 0x2de   :  { %2189 = vmatprep.subr.bf16.mxu1 %v2319_v3 }
 0x2e1   :  { %2191 = vmatpush3.bf16.msra.mxu1 %v2436_v13 }
 0x2e2   :  { %2192 = vmatprep.subr.bf16.mxu1 %v2319_v3 }
 0x2e5   :  { %2194 = vmatpush3.bf16.msra.mxu1 %v2465_v17 }
 0x2e6   :  { %2195 = vmatprep.subr.bf16.mxu1 %v2319_v3 }
 0x2e9   :  { %2197 = vmatpush3.bf16.msra.mxu1 %v2493_v22 }
 0x2ea   :  { %2198 = vmatprep.subr.bf16.mxu1 %v2319_v3 }
 0x2ed   :  { %2200 = vmatpush3.bf16.msra.mxu1 %v2525_v25 }
 0x2ee   :  { %2201 = vmatprep.subr.bf16.mxu1 %v2319_v3 }
 0x2f1   :  { %2203 = vmatpush3.bf16.msra.mxu1 %v2550_v30 }
 0x2f2   :  { %2228 = vmatprep.subr.bf16.mxu1 %v2319_v3 }
 0x3a7   :  { %v634_v28 = vpop.f32.mrb[4].mxu1 }
 0x3a8   :  { %v638_v29 = vadd.f32 %v634_v28, %v567_v16  ;;  %v1875_v31 = vpop.f32.mrb[5].mxu1  ;;  %v2280_v16 = vpack.c.bf16 %v1254_v14, %v1253_v12 }
 0x3aa   :  { %2294 = vtanh.f32 %v638_v29 }
 0x3b4   :  { %v2869_v32 = vpop.eup %2294 }
 0x3b5   :  { %1909 = vmatmul.mubr.f32.vlgmr.msra.gmra.mrb[2].mxu0 %v2869_v32 }
 0x3b6   :  { %2206 = vmatpush3.bf16.msra.mxu0 %v2375_v4  ;;  %1978 = vmatprep.mubr.msk.f32.mxu0 %vm2320_vm0, %v2321_v6 }
 0x3b7   :  { %2207 = vmatprep.subr.bf16.mxu0 %v2319_v3 }
 0x3ba   :  { %2209 = vmatpush3.bf16.msra.mxu0 %v2390_v7 }
 0x3bb   :  { %2210 = vmatprep.subr.bf16.mxu0 %v2319_v3 }
 0x3be   :  { %2212 = vmatpush3.bf16.msra.mxu0 %v2414_v10 }
 0x3bf   :  { %2213 = vmatprep.subr.bf16.mxu0 %v2319_v3 }
 0x3c2   :  { %2215 = vmatpush3.bf16.msra.mxu0 %v2436_v13 }
 0x3c3   :  { %2216 = vmatprep.subr.bf16.mxu0 %v2319_v3 }
 0x3c6   :  { %2218 = vmatpush3.bf16.msra.mxu0 %v2465_v17 }
 0x3c7   :  { %2219 = vmatprep.subr.bf16.mxu0 %v2319_v3 }
 0x3ca   :  { %2221 = vmatpush3.bf16.msra.mxu0 %v2493_v22 }
 0x3cb   :  { %2222 = vmatprep.subr.bf16.mxu0 %v2319_v3 }
 0x3ce   :  { %2224 = vmatpush3.bf16.msra.mxu0 %v2525_v25 }
 0x3cf   :  { %2225 = vmatprep.subr.bf16.mxu0 %v2319_v3 }
 0x3d2   :  { %2227 = vmatpush3.bf16.msra.mxu0 %v2550_v30 }
 0x488   :  { %v781_v42 = vpop.f32.mrb[2].mxu0 }
 0x489   :  { %v785_v43 = vadd.f32 %v781_v42, %v714_v33  ;;  %v1910_v44 = vpop.f32.mrb[3].mxu0 }
 0x48b   :  { %2296 = vtanh.f32 %v785_v43 }
 0x495   :  { %v2943_v45 = vpop.eup %2296 }
 0x496   :  { %1944 = vmatmul.mubr.f32.vlgmr.msra.gmra.mrb[6].mxu1 %v2943_v45 }
 0x497   :  { %2230 = vmatpush3.bf16.msra.mxu1 %v2375_v4  ;;  %2013 = vmatprep.mubr.msk.f32.mxu1 %vm2320_vm0, %v2321_v6  ;;  %v1239_v4 = vld [vmem:[%s3162_s4] sm:$0xff]  ;;  %v1240_v6 = vld [vmem:[%s3162_s4 + $0x8] sm:$0xff] }
 0x498   :  { %2231 = vmatprep.subr.bf16.mxu1 %v2319_v3 }
 0x49b   :  { %2233 = vmatpush3.bf16.msra.mxu1 %v2390_v7  ;;  %v2969_v7 = vpack.c.bf16 %v1240_v6, %v1239_v4 }
 0x49c   :  { %2234 = vmatprep.subr.bf16.mxu1 %v2319_v3 }
 0x49d   :  { %2253 = vmatprep.subr.bf16.mxu0 %v2969_v7 }
 0x49f   :  { %2236 = vmatpush3.bf16.msra.mxu1 %v2414_v10  ;;  %v943_v10 = vld [vmem:[%s942_s28] sm:$0x1]  ;;  %s1559_s28 = sld [smem:[#allocation4 + $0x7]] }
 0x4a0   :  { %2237 = vmatprep.subr.bf16.mxu1 %v2319_v3 }
 0x4a3   :  { %2239 = vmatpush3.bf16.msra.mxu1 %v2436_v13  ;;  %v952_v13 = vld [vmem:[%s951_s30] sm:$0x1]  ;;  %s3082_s30 = sld [smem:[#allocation4 + $0x37]] }
 0x4a4   :  { %2240 = vmatprep.subr.bf16.mxu1 %v2319_v3 }
 0x4a5   :  { %p1084_p5 = scmp.ge.s32.totalorder %s1559_s28, 0  ;;  %p1085_p6 = scmp.lt.s32.totalorder %s1559_s28, 32 }
 0x4a7   :  { %2242 = vmatpush3.bf16.msra.mxu1 %v2465_v17  ;;  %v961_v17 = vld [vmem:[%s960_s15] sm:$0x1]  ;;  %p1086_p9 = pnand %p1085_p6, %p1084_p5  ;;  %p1129_p5 = scmp.ge.s32.totalorder %s3080_s21, 0 }
 0x4a8   :  { %2243 = vmatprep.subr.bf16.mxu1 %v2319_v3  ;;  %p1122_p6 = pnand %p1121_p3, %p1120_p2 }
 0x4a9   :  { %s3284_s28 = smov (%p1086_p9, %s1559_s28), 32  ;;  %p1131_p8 = pnand %p1130_p7, %p1129_p5 }
 0x4aa   :  { %s1089_s9 = scalar_lea.vmem %s3159_s1, %s3284_s28  ;;  %s3292_s22 = smov (%p1122_p6, %s3078_s22), 32 }
 0x4ab   :  { %2245 = vmatpush3.bf16.msra.mxu1 %v2493_v22  ;;  %v970_v22 = vld [vmem:[%s969_s23] sm:$0x1]  ;;  %s1125_s26 = scalar_lea.vmem %s3159_s1, %s3292_s22  ;;  %p1138_p9 = scmp.ge.s32.totalorder %s3082_s30, 0 }
 0x4ac   :  { %2246 = vmatprep.subr.bf16.mxu1 %v2319_v3  ;;  %v1126_v21 = vld [vmem:[%s1125_s26] sm:$0x1]  ;;  %s3294_s21 = smov (%p1131_p8, %s3080_s21), 32  ;;  %p1139_p10 = scmp.lt.s32.totalorder %s3082_s30, 32 }
 0x4ad   :  { %s1134_s25 = scalar_lea.vmem %s3159_s1, %s3294_s21 }
 0x4ae   :  { %v1135_v23 = vld [vmem:[%s1134_s25] sm:$0x1]  ;;  %p1140_p13 = pnand %p1139_p10, %p1138_p9 }
 0x4af   :  { %2248 = vmatpush3.bf16.msra.mxu1 %v2525_v25  ;;  %v979_v25 = vld [vmem:[%s978_s10] sm:$0x1] }
 0x4b0   :  { %2249 = vmatprep.subr.bf16.mxu1 %v2319_v3  ;;  %v861_v3 = vld [vmem:[#allocation3] sm:$0xff]  ;;  %s3296_s30 = smov (%p1140_p13, %s3082_s30), 32 }
 0x4b1   :  { %944 = vst [vmem:[#allocation3] sm:$0x1] %v943_v10  ;;  %953 = vst [vmem:[#allocation3 + $0x1] sm:$0x1] %v952_v13  ;;  %s1143_s2 = scalar_lea.vmem %s3159_s1, %s3296_s30 }
 0x4b2   :  { %962 = vst [vmem:[#allocation3 + $0x2] sm:$0x1] %v961_v17  ;;  %971 = vst [vmem:[#allocation3 + $0x3] sm:$0x1] %v970_v22  ;;  %v1144_v24 = vld [vmem:[%s1143_s2] sm:$0x1] }
 0x4b3   :  { %2251 = vmatpush3.bf16.msra.mxu1 %v2550_v30  ;;  %980 = vst [vmem:[#allocation3 + $0x4] sm:$0x1] %v979_v25  ;;  %v988_v30 = vld [vmem:[%s987_s16] sm:$0x1]  ;;  %998 = vst [vmem:[#allocation3 + $0x6] sm:$0x1] %v997_v46 }
 0x4b4   :  { %989 = vst [vmem:[#allocation3 + $0x5] sm:$0x1] %v988_v30  ;;  %1007 = vst [vmem:[#allocation3 + $0x7] sm:$0x1] %v1006_v48 }
 0x569   :  { %v928_v49 = vpop.f32.mrb[6].mxu1 }
 0x56a   :  { %v932_v50 = vadd.f32 %v928_v49, %v861_v3  ;;  %v1945_v51 = vpop.f32.mrb[7].mxu1 }
 0x56c   :  { %2298 = vtanh.f32 %v932_v50 }
 0x576   :  { %v2299_v55 = vpop.eup %2298 }
 0x577   :  { %1979 = vmatmul.mubr.f32.vlgmr.msra.gmra.mrb[4].mxu0 %v2299_v55 }
 0x578   :  { %2255 = vmatpush3.bf16.msra.mxu0 %v2969_v7  ;;  %2048 = vmatprep.mubr.f32.mxu0 %v2644_v47  ;;  %v1248_v47 = vld [vmem:[%s3162_s4 + $0x48] sm:$0xff]  ;;  %s3076_s4 = sld [smem:[#allocation4 + $0x1f]] }
 0x579   :  { %2257 = vmatprep.subr.bf16.mxu0 %v2256_v54  ;;  %v2268_v0 = vpack.c.bf16 %v1248_v47, %v1247_v63 }
 0x57c   :  { %2259 = vmatpush3.bf16.msra.mxu0 %v2256_v54 }
 0x57d   :  { %2261 = vmatprep.subr.bf16.mxu0 %v2260_v58 }
 0x57e   :  { %p1111_p0 = scmp.ge.s32.totalorder %s3076_s4, 0  ;;  %p1112_p1 = scmp.lt.s32.totalorder %s3076_s4, 32 }
 0x580   :  { %2263 = vmatpush3.bf16.msra.mxu0 %v2260_v58  ;;  %p1113_p4 = pnand %p1112_p1, %p1111_p0  ;;  %p1149_p0 = pnand %p1148_p12, %p1147_p11 }
 0x581   :  { %2265 = vmatprep.subr.bf16.mxu0 %v2264_v62 }
 0x582   :  { %s3290_s4 = smov (%p1113_p4, %s3076_s4), 32  ;;  %s3298_s8 = smov (%p1149_p0, %s3084_s8), 32 }
 0x583   :  { %s1116_s17 = scalar_lea.vmem %s3159_s1, %s3290_s4  ;;  %s1152_s22 = scalar_lea.vmem %s3159_s1, %s3298_s8 }
 0x584   :  { %2267 = vmatpush3.bf16.msra.mxu0 %v2264_v62  ;;  %v1117_v20 = vld [vmem:[%s1116_s17] sm:$0x1] }
 0x585   :  { %2269 = vmatprep.subr.bf16.mxu0 %v2268_v0  ;;  %v1153_v26 = vld [vmem:[%s1152_s22] sm:$0x1] }
 0x588   :  { %2271 = vmatpush3.bf16.msra.mxu0 %v2268_v0 }
 0x589   :  { %2273 = vmatprep.subr.bf16.mxu0 %v2272_v5 }
 0x58c   :  { %2275 = vmatpush3.bf16.msra.mxu0 %v2272_v5 }
 0x58d   :  { %2277 = vmatprep.subr.bf16.mxu0 %v2276_v11 }
 0x590   :  { %2279 = vmatpush3.bf16.msra.mxu0 %v2276_v11 }
 0x591   :  { %2281 = vmatprep.subr.bf16.mxu0 %v2280_v16 }
 0x594   :  { %2283 = vmatpush3.bf16.msra.mxu0 %v2280_v16 }
 0x597   :  { %2049 = vmatmul.mubr.f32.vlgmr.msra.gmra.mrb[6].mxu0 %v2719_v60  ;;  %v1008_v60 = vld [vmem:[#allocation3] sm:$0xff] }
 0x598   :  { %2051 = vmatprep.mubr.f32.mxu0 %v2794_v15  ;;  %v1090_v15 = vld [vmem:[%s1089_s9] sm:$0x1]  ;;  %1100 = vst [vmem:[#allocation3 + $0x1] sm:$0x1] %v1099_v18  ;;  %1109 = vst [vmem:[#allocation3 + $0x2] sm:$0x1] %v1108_v19 }
 0x599   :  { %1091 = vst [vmem:[#allocation3] sm:$0x1] %v1090_v15  ;;  %1118 = vst [vmem:[#allocation3 + $0x3] sm:$0x1] %v1117_v20 }
 0x59a   :  { %1127 = vst [vmem:[#allocation3 + $0x4] sm:$0x1] %v1126_v21  ;;  %1136 = vst [vmem:[#allocation3 + $0x5] sm:$0x1] %v1135_v23 }
 0x59b   :  { %2052 = vmatmul.mubr.f32.gmra.mrb[8].mxu0 %v2869_v32  ;;  %1145 = vst [vmem:[#allocation3 + $0x6] sm:$0x1] %v1144_v24  ;;  %1154 = vst [vmem:[#allocation3 + $0x7] sm:$0x1] %v1153_v26  ;;  %v1575_v32 = vld [vmem:[%s3163_s5] ss:$0 sm:$0xff] }
 0x59c   :  { %2054 = vmatprep.mubr.f32.mxu0 %v2943_v45 }
 0x59f   :  { %2055 = vmatmul.mubr.f32.gmra.mrb[10].mxu0 %v2299_v55 }
 0x5a2   :  { %v1155_v45 = vld [vmem:[#allocation3] sm:$0xff] }
 0x64a   :  { %v1075_v27 = vpop.f32.mrb[4].mxu0 }
 0x64b   :  { %v1079_v28 = vadd.f32 %v1075_v27, %v1008_v60  ;;  %v1980_v29 = vpop.f32.mrb[5].mxu0 }
 0x64d   :  { %2300 = vtanh.f32 %v1079_v28 }
 0x657   :  { %v2301_v31 = vpop.eup %2300 }
 0x658   :  { %2014 = vmatmul.mubr.f32.vlgmr.msra.gmra.mrb[8].mxu1 %v2301_v31  ;;  %2057 = vmatprep.mubr.f32.mxu0 %v2301_v31 }
 0x66a   :  { %v2050_v33 = vpop.f32.mrb[6].mxu0 }
 0x66b   :  { %v1334_v34 = vadd.f32 %v2050_v33, %v1575_v32  ;;  %v1328_v35 = vpop.f32.mrb[7].mxu0 }
 0x66c   :  { %v1329_v36 = vadd.f32 %v1575_v32, %v1328_v35 }
 0x66d   :  { %1368 = vst [vmem:[%s3164_s6 + $0x8] sm:$0xff] %v1334_v34 }
 0x66e   :  { %1367 = vst [vmem:[%s3164_s6] sm:$0xff] %v1329_v36  ;;  %v2053_v37 = vpop.f32.mrb[8].mxu0 }
 0x66f   :  { %v1344_v38 = vadd.f32 %v2053_v37, %v1575_v32  ;;  %v1338_v39 = vpop.f32.mrb[9].mxu0 }
 0x670   :  { %v1339_v40 = vadd.f32 %v1575_v32, %v1338_v39 }
 0x671   :  { %1370 = vst [vmem:[%s3164_s6 + $0x18] sm:$0xff] %v1344_v38 }
 0x672   :  { %1369 = vst [vmem:[%s3164_s6 + $0x10] sm:$0xff] %v1339_v40  ;;  %v2056_v41 = vpop.f32.mrb[10].mxu0 }
 0x673   :  { %v1354_v42 = vadd.f32 %v2056_v41, %v1575_v32  ;;  %v1348_v43 = vpop.f32.mrb[11].mxu0 }
 0x674   :  { %v1349_v44 = vadd.f32 %v1575_v32, %v1348_v43 }
 0x675   :  { %1372 = vst [vmem:[%s3164_s6 + $0x28] sm:$0xff] %v1354_v42 }
 0x676   :  { %1371 = vst [vmem:[%s3164_s6 + $0x20] sm:$0xff] %v1349_v44 }
 0x72b   :  { %v1222_v4 = vpop.f32.mrb[8].mxu1 }
 0x72c   :  { %v1226_v6 = vadd.f32 %v1222_v4, %v1155_v45  ;;  %v2015_v7 = vpop.f32.mrb[9].mxu1 }
 0x72e   :  { %2302 = vtanh.f32 %v1226_v6 }
 0x738   :  { %v2303_v3 = vpop.eup %2302 }
 0x739   :  { %1230 = vst [vmem:[%s3165_s7] sm:$0xff] %v2303_v3  ;;  %2058 = vmatmul.mubr.f32.gmra.mrb[12].mxu0 %v2303_v3 }
 0x80c   :  { %v2059_v10 = vpop.f32.mrb[12].mxu0 }
 0x80d   :  { %v1364_v13 = vadd.f32 %v2059_v10, %v1575_v32  ;;  %v1358_v17 = vpop.f32.mrb[13].mxu0 }
 0x80e   :  { %v1359_v22 = vadd.f32 %v1575_v32, %v1358_v17 }
 0x80f   :  { %1374 = vst [vmem:[%s3164_s6 + $0x38] sm:$0xff] %v1364_v13 }
 0x810   :  { %1373 = vst [vmem:[%s3164_s6 + $0x30] sm:$0xff] %v1359_v22 }
 0x811   :  { %1383 = vsyncpa [#allocation5], 1 }

</bundles_post_ra>
